<compile_context>
chip_gen: v7x
topology: tpu7x:2x2x1
jax: 0.10.0
libtpu: 0.0.40
codegen_flags: <defaults>
</compile_context>

<pallas_src>
import functools

import jax
import jax.numpy as jnp
from jax import lax
from jax.experimental import pallas as pl
from jax.experimental.pallas import tpu as pltpu

EPS = 1e-5
LANE = 128
PR_IN = 3   # zero rows added above/below the image for the in-kernel conv1 taps
OFF = 8     # sublane-aligned guard rows around the out1 scratch


def _round_up(n, m):
    return (n + m - 1) // m * m


def _pick_row_block(Hout, Wp, row_block):
    if row_block is not None:
        assert Hout % row_block == 0 and (row_block % 8 == 0 or row_block == Hout), (
            f"row_block must divide Hout and be a multiple of 8 (got "
            f"{row_block}, Hout={Hout})")
        return row_block
    divs = [d for d in range(8, Hout + 1, 8) if Hout % d == 0]
    if not divs:
        return Hout
    for d in divs:                       # ~>=512 flat rows/step: near roofline
        if d * Wp >= 512:
            return d
    return divs[-1]


def _residual_kernel(*refs, Hout, Wp, TH, Cp_in, Cp_out, from_patches,
                     identity_sc):
    """One (image, row-block) step.  Spatial data is flattened row-major over
    the width-padded out grid (Wp = Wout + 2; the border columns are conv2's
    zero padding)."""
    if from_patches:
        if identity_sc:
            p_ref, xsc_ref, w1_ref, w2_ref, vm_ref, bn_ref, out_ref, scr = refs
            wsc_ref = None
        else:
            (p_ref, xsc_ref, w1_ref, w2_ref, wsc_ref, vm_ref, bn_ref,
             out_ref, scr) = refs
    else:
        if identity_sc:
            x_ref, w1_ref, w2_ref, vm_ref, bn_ref, out_ref, scr = refs
            wsc_ref = None
        else:
            x_ref, w1_ref, w2_ref, wsc_ref, vm_ref, bn_ref, out_ref, scr = refs

    r0 = pl.program_id(1) * TH              # first output row of this block
    ext_rows = (TH + 2) * Wp                # conv1 rows incl. conv2's halo
    out_rows = TH * Wp

    # ---- conv1 over the extended (halo) rows ----
    if from_patches:
        # Patches live on the padded out grid (1 zero row above/below); the
        # contraction dim is the flattened 9*Cin padded to a lane multiple.
        patches = p_ref[0, pl.ds(r0 * Wp, ext_rows), :]
        acc1 = jnp.dot(patches, w1_ref[...],
                       preferred_element_type=jnp.float32)
    else:
        acc1 = None
        for ky in range(3):
            for kx in range(3):
                t = ky * 3 + kx
                start = (r0 + ky + PR_IN - 2) * Wp + (kx - 1)
                slab = x_ref[0, pl.ds(start, ext_rows), :]
                part = jnp.dot(slab, w1_ref[t * Cp_in:(t + 1) * Cp_in, :],
                               preferred_element_type=jnp.float32)
                acc1 = part if acc1 is None else acc1 + part

    # BN1 + ReLU (Dropout2d == identity in eval mode), then zero the
    # conv-padding positions so out1 acts as conv2's zero padding.
    # TODO(synk): training-mode Dropout2d (channel dropout) not implemented.
    out1 = jnp.maximum(acc1 * bn_ref[0:1, :] + bn_ref[1:2, :], 0.0)
    out1 = out1 * vm_ref[pl.ds(r0 * Wp, ext_rows), :]
    scr[0:OFF, :] = jnp.zeros((OFF, Cp_out), jnp.bfloat16)
    scr[OFF + ext_rows:2 * OFF + ext_rows, :] = jnp.zeros((OFF, Cp_out),
                                                          jnp.bfloat16)
    scr[OFF:OFF + ext_rows, :] = out1.astype(jnp.bfloat16)

    # ---- conv2 -> BN2: per-tap matmuls, f32 dot-accumulate chain ----
    acc2 = None
    for ky in range(3):
        for kx in range(3):
            t = ky * 3 + kx
            start = OFF + ky * Wp + kx - 1          # static slice
            slab = scr[start:start + out_rows, :]
            part = jnp.dot(slab, w2_ref[t * Cp_out:(t + 1) * Cp_out, :],
                           preferred_element_type=jnp.float32)
            acc2 = part if acc2 is None else acc2 + part
    out2 = acc2 * bn_ref[2:3, :] + bn_ref[3:4, :]

    # ---- shortcut ----
    if from_patches:
        x_sc = xsc_ref[0]
    else:
        x_sc = x_ref[0, pl.ds((r0 + PR_IN) * Wp, out_rows), :]
    if identity_sc:
        sc = x_sc.astype(jnp.float32)
    else:
        sc = jnp.dot(x_sc, wsc_ref[...], preferred_element_type=jnp.float32)
        sc = sc * bn_ref[4:5, :] + bn_ref[5:6, :]

    out_ref[0] = jnp.maximum(out2 + sc, 0.0).astype(out_ref.dtype)


def residual_block_forward(x_nchw, params, *, stride=1, use_bn=True,
                           row_block=None, conv1_mode="auto"):
    """Fused ResidualBlock forward (eval mode).  Returns NCHW f32."""
    N, Cin, H, W = x_nchw.shape
    w1, w2 = params["w1"], params["w2"]
    Cout = w1.shape[0]
    Hout = (H + 2 - 3) // stride + 1
    Wout = (W + 2 - 3) // stride + 1
    Wp = Wout + 2
    Cp_in, Cp_out = _round_up(Cin, LANE), _round_up(Cout, LANE)
    identity_sc = (stride == 1 and Cin == Cout)

    if conv1_mode == "auto":
        from_patches = (stride != 1) or (9 * Cin <= LANE)
    elif conv1_mode == "patches":
        from_patches = True
    else:
        assert stride == 1, "in-kernel ('tap') conv1 requires stride == 1"
        from_patches = False

    TH = _pick_row_block(Hout, Wp, row_block)
    R = Hout // TH
    ext_rows = (TH + 2) * Wp
    out_rows = TH * Wp

    # NCHW -> NHWC at the module boundary only.
    # TODO(synk): a full stack should keep activations NHWC/bf16 end-to-end
    # and drop these wrapper-side layout passes entirely.
    x = jnp.transpose(x_nchw, (0, 2, 3, 1)).astype(jnp.float32)

    # ---- fold BN (running stats) into per-channel scale/shift ----
    def bn_affine(prefix):
        g, b = params[prefix + "_gamma"], params[prefix + "_beta"]
        m, v = params[prefix + "_mean"], params[prefix + "_var"]
        scale = g / jnp.sqrt(v + EPS)
        shift = b - m * scale
        pad = (0, Cp_out - Cout)
        return jnp.pad(scale, pad), jnp.pad(shift, pad)

    ones = jnp.pad(jnp.ones((Cout,), jnp.float32), (0, Cp_out - Cout))
    zeros = jnp.zeros((Cp_out,), jnp.float32)
    scale1, shift1 = bn_affine("bn1") if use_bn else (ones, zeros)
    scale2, shift2 = bn_affine("bn2") if use_bn else (ones, zeros)
    scale_sc, shift_sc = (ones, zeros) if identity_sc else bn_affine("bnsc")
    bn_pack = jnp.stack([scale1, shift1, scale2, shift2, scale_sc, shift_sc], 0)

    # ---- weights: torch OIHW -> tap-major, channel-padded, bf16 ----
    def pack_w3x3_per_tap(w, cpi, cpo):
        co, ci = w.shape[0], w.shape[1]
        wt = jnp.transpose(w, (2, 3, 1, 0))
        wt = jnp.pad(wt, ((0, 0), (0, 0), (0, cpi - ci), (0, cpo - co)))
        return wt.reshape(9 * cpi, cpo).astype(jnp.bfloat16)

    def pack_w3x3_flat(w, cpo):
        co, ci = w.shape[0], w.shape[1]
        wt = jnp.transpose(w, (2, 3, 1, 0)).reshape(9 * ci, co)
        k1 = _round_up(9 * ci, LANE)
        wt = jnp.pad(wt, ((0, k1 - 9 * ci), (0, cpo - co)))
        return wt.astype(jnp.bfloat16), k1

    w2_flat = pack_w3x3_per_tap(w2, Cp_out, Cp_out)

    # Validity mask over the padded out grid (1 inside the image, 0 at the
    # conv-padding rows/cols); tiny, sliced with pl.ds in-kernel.
    row_ok = (jnp.arange(Hout + 2) >= 1) & (jnp.arange(Hout + 2) <= Hout)
    col_ok = (jnp.arange(Wp) >= 1) & (jnp.arange(Wp) <= Wout)
    vmask = (row_ok[:, None] & col_ok[None, :]).astype(jnp.float32)
    vmask = vmask.reshape((Hout + 2) * Wp, 1)

    def nbytes(shape, dtype):
        n = 1
        for d in shape:
            n *= int(d)
        return n * jnp.dtype(dtype).itemsize

    inputs, in_specs, blk_bytes = [], [], []

    def add_input(arr, block_shape, index_map):
        inputs.append(arr)
        in_specs.append(pl.BlockSpec(block_shape, index_map))
        blk_bytes.append(nbytes(block_shape, arr.dtype))

    if from_patches:
        # conv1 patches on the padded out grid; K = 9*Cin padded to 128.
        # TODO(synk): for strided blocks with large Cin this still reads ~9x
        # the input from HBM; a space-to-depth in-kernel gather would fix it.
        xp = jnp.pad(x, ((0, 0), (1, 1), (1, 1), (0, 0)))
        taps = [xp[:, ky:ky + (Hout - 1) * stride + 1:stride,
                   kx:kx + (Wout - 1) * stride + 1:stride, :]
                for ky in range(3) for kx in range(3)]
        patches = jnp.concatenate(taps, -1)                 # (N,Ho,Wo,9*Cin)
        w1_flat, K1 = pack_w3x3_flat(w1, Cp_out)
        patches = jnp.pad(patches,
                          ((0, 0), (1, 1), (1, 1), (0, K1 - 9 * Cin)))
        patches = patches.reshape(N, (Hout + 2) * Wp, K1).astype(jnp.bfloat16)
        add_input(patches, (1, (Hout + 2) * Wp, K1), lambda n, r: (n, 0, 0))
        # Shortcut input on the (halo-free) out grid: normally row-blocked.
        x_sc = x[:, ::stride, ::stride, :]
        x_sc = jnp.pad(x_sc, ((0, 0), (0, 0), (1, 1), (0, Cp_in - Cin)))
        x_sc = x_sc.reshape(N, Hout * Wp, Cp_in).astype(jnp.bfloat16)
        add_input(x_sc, (1, out_rows, Cp_in), lambda n, r: (n, r, 0))
    else:
        # Stride 1: conv1 fully in-kernel from the zero-padded input kept
        # resident in VMEM per image (the fused conv1+conv2 row halo needs
        # overlapping windows, which blocked BlockSpecs cannot express).
        # TODO(synk): for very large images, manually DMA a (row_block+4)-row
        # halo window per step instead of keeping the full image resident.
        xp = jnp.pad(x, ((0, 0), (PR_IN, PR_IN), (1, 1), (0, Cp_in - Cin)))
        xp = xp.reshape(N, (H + 2 * PR_IN) * Wp, Cp_in).astype(jnp.bfloat16)
        add_input(xp, (1, (H + 2 * PR_IN) * Wp, Cp_in), lambda n, r: (n, 0, 0))
        w1_flat = pack_w3x3_per_tap(w1, Cp_in, Cp_out)
        K1 = 9 * Cp_in

    add_input(w1_flat, w1_flat.shape, lambda n, r: (0, 0))
    add_input(w2_flat, w2_flat.shape, lambda n, r: (0, 0))
    if not identity_sc:
        wsc = params["wsc"][:, :, 0, 0].T
        wsc = jnp.pad(wsc, ((0, Cp_in - Cin), (0, Cp_out - Cout)))
        add_input(wsc.astype(jnp.bfloat16), (Cp_in, Cp_out),
                  lambda n, r: (0, 0))
    add_input(vmask, vmask.shape, lambda n, r: (0, 0))
    add_input(bn_pack, bn_pack.shape, lambda n, r: (0, 0))
    # TODO(synk): pl.Buffered(1) on the constant-index specs (weights/mask/bn)
    # would drop their second pipeline buffer (cheap VMEM recovery on v7x).

    kernel = functools.partial(
        _residual_kernel, Hout=Hout, Wp=Wp, TH=TH, Cp_in=Cp_in, Cp_out=Cp_out,
        from_patches=from_patches, identity_sc=identity_sc)

    scr_shape = (2 * OFF + ext_rows, Cp_out)

    # VMEM budget: double-buffered IO blocks + scratch + f32 accumulators.
    vmem_need = 2 * sum(blk_bytes)
    vmem_need += 2 * nbytes((1, out_rows, Cp_out), jnp.bfloat16)
    vmem_need += nbytes(scr_shape, jnp.bfloat16)
    vmem_need += 4 * nbytes((ext_rows, Cp_out), jnp.float32)
    vmem_limit = int(min(100 * 2**20, max(32 * 2**20, 2 * vmem_need)))

    k_sc = 0 if identity_sc else Cp_in
    cost = pl.CostEstimate(
        flops=int(2 * N * R * (ext_rows * Cp_out * K1
                               + out_rows * Cp_out * 9 * Cp_out
                               + out_rows * Cp_out * k_sc)),
        transcendentals=0,
        bytes_accessed=int(sum(int(a.size) * a.dtype.itemsize for a in inputs)
                           + N * Hout * Wp * Cp_out * 2))

    out_flat = pl.pallas_call(
        kernel,
        out_shape=jax.ShapeDtypeStruct((N, Hout * Wp, Cp_out), jnp.bfloat16),
        grid=(N, R),
        in_specs=in_specs,
        out_specs=pl.BlockSpec((1, out_rows, Cp_out), lambda n, r: (n, r, 0)),
        scratch_shapes=[pltpu.VMEM(scr_shape, jnp.bfloat16)],
        compiler_params=pltpu.CompilerParams(
            dimension_semantics=("parallel", "parallel"),
            vmem_limit_bytes=vmem_limit),
        cost_estimate=cost,
    )(*inputs)

    out = out_flat.reshape(N, Hout, Wp, Cp_out)[:, :, 1:1 + Wout, :Cout]
    # Back to the module's NCHW/f32 contract (a full stack would stay bf16).
    return jnp.transpose(out, (0, 3, 1, 2)).astype(jnp.float32)


def reference_forward(x, params, *, stride=1, use_bn=True):
    """Pure-JAX f32 NCHW reference mirroring the PyTorch module (eval mode)."""
    def conv(v, w, s, pad):
        return lax.conv_general_dilated(
            v, w, (s, s), ((pad, pad), (pad, pad)),
            dimension_numbers=("NCHW", "OIHW", "NCHW"))

    def bn(v, prefix):
        g = params[prefix + "_gamma"][None, :, None, None]
        b = params[prefix + "_beta"][None, :, None, None]
        m = params[prefix + "_mean"][None, :, None, None]
        var = params[prefix + "_var"][None, :, None, None]
        return (v - m) / jnp.sqrt(var + EPS) * g + b

    Cin = x.shape[1]
    Cout = params["w1"].shape[0]
    out = conv(x, params["w1"], stride, 1)
    if use_bn:
        out = bn(out, "bn1")
    out = jnp.maximum(out, 0.0)
    out = conv(out, params["w2"], 1, 1)
    if use_bn:
        out = bn(out, "bn2")
    if stride != 1 or Cin != Cout:
        sc = bn(conv(x, params["wsc"], stride, 0), "bnsc")
    else:
        sc = x
    return jnp.maximum(out + sc, 0.0)


def make_params(key, cin, cout):
    ks = jax.random.split(key, 16)

    def bn_params(k):
        k1, k2, k3, k4 = jax.random.split(k, 4)
        return (1.0 + 0.1 * jax.random.normal(k1, (cout,), jnp.float32),
                0.1 * jax.random.normal(k2, (cout,), jnp.float32),
                0.1 * jax.random.normal(k3, (cout,), jnp.float32),
                0.5 + jnp.abs(jax.random.normal(k4, (cout,), jnp.float32)))

    p = {
        "w1": 0.2 * jax.random.normal(ks[0], (cout, cin, 3, 3), jnp.float32),
        "w2": 0.2 * jax.random.normal(ks[1], (cout, cout, 3, 3), jnp.float32),
        "wsc": 0.2 * jax.random.normal(ks[2], (cout, cin, 1, 1), jnp.float32),
    }
    for prefix, k in (("bn1", ks[3]), ("bn2", ks[4]), ("bnsc", ks[5])):
        g, b, m, v = bn_params(k)
        p[prefix + "_gamma"], p[prefix + "_beta"] = g, b
        p[prefix + "_mean"], p[prefix + "_var"] = m, v
    return p


def _check(x, params, *, stride, use_bn, row_block, conv1_mode, label):
    out = jax.block_until_ready(residual_block_forward(
        x, params, stride=stride, use_bn=use_bn, row_block=row_block,
        conv1_mode=conv1_mode))
    ref = jax.block_until_ready(
        reference_forward(x, params, stride=stride, use_bn=use_bn))
    assert out.shape == ref.shape, (label, out.shape, ref.shape)
    err = float(jnp.max(jnp.abs(out - ref)))
    # bf16 MXU operands (f32 accumulation) vs the pure-f32 reference.
    assert jnp.allclose(out, ref, atol=6e-2, rtol=3e-2), (label, err)
    return err


if __name__ == "__main__":
    key = jax.random.PRNGKey(0)
    kx1, kp1, kx2, kp2, kx3, kp3, kx4, kp4 = jax.random.split(key, 8)

    # 1) conv shortcut, stride 1, 9*Cin <= 128 -> packed-patches conv1;
    #    row_block=8 exercises the fused-conv row halo (2 row blocks).
    x1 = jax.random.normal(kx1, (2, 4, 16, 16), jnp.float32)
    p1 = make_params(kp1, 4, 8)
    _check(x1, p1, stride=1, use_bn=True, row_block=8, conv1_mode="auto",
           label="conv_shortcut_s1_patches")

    # 2) identity shortcut, no BN, forced in-kernel per-tap conv1 path.
    x2 = jax.random.normal(kx2, (2, 8, 16, 16), jnp.float32)
    p2 = make_params(kp2, 8, 8)
    _check(x2, p2, stride=1, use_bn=False, row_block=8, conv1_mode="tap",
           label="identity_s1_tap")

    # 3) conv shortcut with the per-tap conv1 path (tap conv1 + 1x1 shortcut).
    x3 = jax.random.normal(kx3, (2, 8, 16, 16), jnp.float32)
    p3 = make_params(kp3, 8, 16)
    _check(x3, p3, stride=1, use_bn=True, row_block=8, conv1_mode="tap",
           label="conv_shortcut_s1_tap")

    # 4) identity shortcut via the packed-patches conv1 path.
    x4 = jax.random.normal(kx4, (2, 4, 16, 16), jnp.float32)
    p4 = make_params(kp4, 4, 4)
    _check(x4, p4, stride=1, use_bn=True, row_block=8, conv1_mode="auto",
           label="identity_s1_patches")

    # 5) strided block (stride 2): packed patches + strided 1x1 shortcut.
    _check(x1, p1, stride=2, use_bn=True, row_block=None, conv1_mode="auto",
           label="conv_shortcut_s2")

    print("KERNEL_OK")
</pallas_src>

<mosaic_0001>
module attributes {stable_mosaic.version = 11 : i64} {
  func.func @_residual_kernel(%arg0: i32, %arg1: i32, %arg2: memref<1x324x128xbf16, #tpu.memory_space<vmem>>, %arg3: memref<1x144x128xbf16, #tpu.memory_space<vmem>>, %arg4: memref<128x128xbf16, #tpu.memory_space<vmem>>, %arg5: memref<1152x128xbf16, #tpu.memory_space<vmem>>, %arg6: memref<128x128xbf16, #tpu.memory_space<vmem>>, %arg7: memref<324x1xf32, #tpu.memory_space<vmem>>, %arg8: memref<6x128xf32, #tpu.memory_space<vmem>>, %arg9: memref<1x144x128xbf16, #tpu.memory_space<vmem>>, %arg10: memref<196x128xbf16, #tpu.memory_space<vmem>>) attributes {dimension_semantics = [#tpu.dimension_semantics<parallel>, #tpu.dimension_semantics<parallel>], iteration_bounds = array<i64: 2, 2>, scalar_prefetch = 0 : i64, scratch_operands = 1 : i64, tpu.core_type = #tpu.core_type<tc>, window_params = [{transform_indices = @transform_0, window_bounds = array<i64: 1, 324, 128>}, {transform_indices = @transform_1, window_bounds = array<i64: 1, 144, 128>}, {pipeline_mode = #tpu.pipeline_mode<synchronous>, transform_indices = @transform_2, window_bounds = array<i64: 128, 128>}, {pipeline_mode = #tpu.pipeline_mode<synchronous>, transform_indices = @transform_3, window_bounds = array<i64: 1152, 128>}, {pipeline_mode = #tpu.pipeline_mode<synchronous>, transform_indices = @transform_4, window_bounds = array<i64: 128, 128>}, {pipeline_mode = #tpu.pipeline_mode<synchronous>, transform_indices = @transform_5, window_bounds = array<i64: 324, 1>}, {pipeline_mode = #tpu.pipeline_mode<synchronous>, transform_indices = @transform_6, window_bounds = array<i64: 6, 128>}, {transform_indices = @transform_7, window_bounds = array<i64: 1, 144, 128>}]} {
    %c8_i32 = arith.constant 8 : i32
    %0 = arith.muli %arg1, %c8_i32 : i32
    %c18_i32 = arith.constant 18 : i32
    %1 = arith.muli %0, %c18_i32 : i32
    %c0 = arith.constant 0 : index
    %2 = arith.index_cast %1 : i32 to index
    %c0_0 = arith.constant 0 : index
    %3 = vector.load %arg2[%c0, %2, %c0_0] : memref<1x324x128xbf16, #tpu.memory_space<vmem>>, vector<1x180x128xbf16>
    %4 = vector.shape_cast %3 : vector<1x180x128xbf16> to vector<180x128xbf16>
    %c0_1 = arith.constant 0 : index
    %c0_2 = arith.constant 0 : index
    %5 = vector.load %arg4[%c0_1, %c0_2] : memref<128x128xbf16, #tpu.memory_space<vmem>>, vector<128x128xbf16>
    %cst = arith.constant dense<0.000000e+00> : vector<180x128xf32>
    %6 = tpu.matmul %4, %5, %cst {dimension_numbers = #tpu.dot_dimension_numbers<[1], [0], [0], [1], [0, 0, 1, 1], [], []>} : vector<180x128xbf16>, vector<128x128xbf16>, vector<180x128xf32> -> vector<180x128xf32>
    %c0_3 = arith.constant 0 : index
    %c0_4 = arith.constant 0 : index
    %7 = vector.load %arg8[%c0_3, %c0_4] : memref<6x128xf32, #tpu.memory_space<vmem>>, vector<1x128xf32>
    %8 = vector.broadcast %7 : vector<1x128xf32> to vector<180x128xf32>
    %9 = arith.mulf %6, %8 : vector<180x128xf32>
    %c1 = arith.constant 1 : index
    %c0_5 = arith.constant 0 : index
    %10 = vector.load %arg8[%c1, %c0_5] : memref<6x128xf32, #tpu.memory_space<vmem>>, vector<1x128xf32>
    %11 = vector.broadcast %10 : vector<1x128xf32> to vector<180x128xf32>
    %12 = arith.addf %9, %11 : vector<180x128xf32>
    %cst_6 = arith.constant 0.000000e+00 : f32
    %13 = vector.broadcast %cst_6 : f32 to vector<180x128xf32>
    %14 = arith.maximumf %12, %13 : vector<180x128xf32>
    %c18_i32_7 = arith.constant 18 : i32
    %15 = arith.muli %0, %c18_i32_7 : i32
    %16 = arith.index_cast %15 : i32 to index
    %c0_8 = arith.constant 0 : index
    %17 = vector.load %arg7[%16, %c0_8] : memref<324x1xf32, #tpu.memory_space<vmem>>, vector<180x1xf32>
    %18 = vector.broadcast %17 : vector<180x1xf32> to vector<180x128xf32>
    %19 = arith.mulf %14, %18 : vector<180x128xf32>
    %cst_9 = arith.constant 0.000000e+00 : bf16
    %20 = vector.broadcast %cst_9 : bf16 to vector<8x128xbf16>
    %c0_10 = arith.constant 0 : index
    %c0_11 = arith.constant 0 : index
    %21 = vector.load %arg10[%c0_10, %c0_11] : memref<196x128xbf16, #tpu.memory_space<vmem>>, vector<8x128xbf16>
    tpu.vector_store %arg10[%c0_10, %c0_11], %20 {strides = array<i32>} : memref<196x128xbf16, #tpu.memory_space<vmem>>, vector<8x128xbf16>,
    %cst_12 = arith.constant 0.000000e+00 : bf16
    %22 = vector.broadcast %cst_12 : bf16 to vector<8x128xbf16>
    %c188 = arith.constant 188 : index
    %c0_13 = arith.constant 0 : index
    %23 = vector.load %arg10[%c188, %c0_13] : memref<196x128xbf16, #tpu.memory_space<vmem>>, vector<8x128xbf16>
    tpu.vector_store %arg10[%c188, %c0_13], %22 {strides = array<i32>} : memref<196x128xbf16, #tpu.memory_space<vmem>>, vector<8x128xbf16>,
    %24 = arith.truncf %19 : vector<180x128xf32> to vector<180x128xbf16>
    %c8 = arith.constant 8 : index
    %c0_14 = arith.constant 0 : index
    %25 = vector.load %arg10[%c8, %c0_14] : memref<196x128xbf16, #tpu.memory_space<vmem>>, vector<180x128xbf16>
    tpu.vector_store %arg10[%c8, %c0_14], %24 {strides = array<i32>} : memref<196x128xbf16, #tpu.memory_space<vmem>>, vector<180x128xbf16>,
    %c7 = arith.constant 7 : index
    %c0_15 = arith.constant 0 : index
    %26 = vector.load %arg10[%c7, %c0_15] : memref<196x128xbf16, #tpu.memory_space<vmem>>, vector<144x128xbf16>
    %c0_16 = arith.constant 0 : index
    %c0_17 = arith.constant 0 : index
    %27 = vector.load %arg5[%c0_16, %c0_17] : memref<1152x128xbf16, #tpu.memory_space<vmem>>, vector<128x128xbf16>
    %cst_18 = arith.constant dense<0.000000e+00> : vector<144x128xf32>
    %28 = tpu.matmul %26, %27, %cst_18 {dimension_numbers = #tpu.dot_dimension_numbers<[1], [0], [0], [1], [0, 0, 1, 1], [], []>} : vector<144x128xbf16>, vector<128x128xbf16>, vector<144x128xf32> -> vector<144x128xf32>
    %c8_19 = arith.constant 8 : index
    %c0_20 = arith.constant 0 : index
    %29 = vector.load %arg10[%c8_19, %c0_20] : memref<196x128xbf16, #tpu.memory_space<vmem>>, vector<144x128xbf16>
    %c128 = arith.constant 128 : index
    %c0_21 = arith.constant 0 : index
    %30 = vector.load %arg5[%c128, %c0_21] : memref<1152x128xbf16, #tpu.memory_space<vmem>>, vector<128x128xbf16>
    %cst_22 = arith.constant dense<0.000000e+00> : vector<144x128xf32>
    %31 = tpu.matmul %29, %30, %cst_22 {dimension_numbers = #tpu.dot_dimension_numbers<[1], [0], [0], [1], [0, 0, 1, 1], [], []>} : vector<144x128xbf16>, vector<128x128xbf16>, vector<144x128xf32> -> vector<144x128xf32>
    %32 = arith.addf %28, %31 : vector<144x128xf32>
    %c9 = arith.constant 9 : index
    %c0_23 = arith.constant 0 : index
    %33 = vector.load %arg10[%c9, %c0_23] : memref<196x128xbf16, #tpu.memory_space<vmem>>, vector<144x128xbf16>
    %c256 = arith.constant 256 : index
    %c0_24 = arith.constant 0 : index
    %34 = vector.load %arg5[%c256, %c0_24] : memref<1152x128xbf16, #tpu.memory_space<vmem>>, vector<128x128xbf16>
    %cst_25 = arith.constant dense<0.000000e+00> : vector<144x128xf32>
    %35 = tpu.matmul %33, %34, %cst_25 {dimension_numbers = #tpu.dot_dimension_numbers<[1], [0], [0], [1], [0, 0, 1, 1], [], []>} : vector<144x128xbf16>, vector<128x128xbf16>, vector<144x128xf32> -> vector<144x128xf32>
    %36 = arith.addf %32, %35 : vector<144x128xf32>
    %c25 = arith.constant 25 : index
    %c0_26 = arith.constant 0 : index
    %37 = vector.load %arg10[%c25, %c0_26] : memref<196x128xbf16, #tpu.memory_space<vmem>>, vector<144x128xbf16>
    %c384 = arith.constant 384 : index
    %c0_27 = arith.constant 0 : index
    %38 = vector.load %arg5[%c384, %c0_27] : memref<1152x128xbf16, #tpu.memory_space<vmem>>, vector<128x128xbf16>
    %cst_28 = arith.constant dense<0.000000e+00> : vector<144x128xf32>
    %39 = tpu.matmul %37, %38, %cst_28 {dimension_numbers = #tpu.dot_dimension_numbers<[1], [0], [0], [1], [0, 0, 1, 1], [], []>} : vector<144x128xbf16>, vector<128x128xbf16>, vector<144x128xf32> -> vector<144x128xf32>
    %40 = arith.addf %36, %39 : vector<144x128xf32>
    %c26 = arith.constant 26 : index
    %c0_29 = arith.constant 0 : index
    %41 = vector.load %arg10[%c26, %c0_29] : memref<196x128xbf16, #tpu.memory_space<vmem>>, vector<144x128xbf16>
    %c512 = arith.constant 512 : index
    %c0_30 = arith.constant 0 : index
    %42 = vector.load %arg5[%c512, %c0_30] : memref<1152x128xbf16, #tpu.memory_space<vmem>>, vector<128x128xbf16>
    %cst_31 = arith.constant dense<0.000000e+00> : vector<144x128xf32>
    %43 = tpu.matmul %41, %42, %cst_31 {dimension_numbers = #tpu.dot_dimension_numbers<[1], [0], [0], [1], [0, 0, 1, 1], [], []>} : vector<144x128xbf16>, vector<128x128xbf16>, vector<144x128xf32> -> vector<144x128xf32>
    %44 = arith.addf %40, %43 : vector<144x128xf32>
    %c27 = arith.constant 27 : index
    %c0_32 = arith.constant 0 : index
    %45 = vector.load %arg10[%c27, %c0_32] : memref<196x128xbf16, #tpu.memory_space<vmem>>, vector<144x128xbf16>
    %c640 = arith.constant 640 : index
    %c0_33 = arith.constant 0 : index
    %46 = vector.load %arg5[%c640, %c0_33] : memref<1152x128xbf16, #tpu.memory_space<vmem>>, vector<128x128xbf16>
    %cst_34 = arith.constant dense<0.000000e+00> : vector<144x128xf32>
    %47 = tpu.matmul %45, %46, %cst_34 {dimension_numbers = #tpu.dot_dimension_numbers<[1], [0], [0], [1], [0, 0, 1, 1], [], []>} : vector<144x128xbf16>, vector<128x128xbf16>, vector<144x128xf32> -> vector<144x128xf32>
    %48 = arith.addf %44, %47 : vector<144x128xf32>
    %c43 = arith.constant 43 : index
    %c0_35 = arith.constant 0 : index
    %49 = vector.load %arg10[%c43, %c0_35] : memref<196x128xbf16, #tpu.memory_space<vmem>>, vector<144x128xbf16>
    %c768 = arith.constant 768 : index
    %c0_36 = arith.constant 0 : index
    %50 = vector.load %arg5[%c768, %c0_36] : memref<1152x128xbf16, #tpu.memory_space<vmem>>, vector<128x128xbf16>
    %cst_37 = arith.constant dense<0.000000e+00> : vector<144x128xf32>
    %51 = tpu.matmul %49, %50, %cst_37 {dimension_numbers = #tpu.dot_dimension_numbers<[1], [0], [0], [1], [0, 0, 1, 1], [], []>} : vector<144x128xbf16>, vector<128x128xbf16>, vector<144x128xf32> -> vector<144x128xf32>
    %52 = arith.addf %48, %51 : vector<144x128xf32>
    %c44 = arith.constant 44 : index
    %c0_38 = arith.constant 0 : index
    %53 = vector.load %arg10[%c44, %c0_38] : memref<196x128xbf16, #tpu.memory_space<vmem>>, vector<144x128xbf16>
    %c896 = arith.constant 896 : index
    %c0_39 = arith.constant 0 : index
    %54 = vector.load %arg5[%c896, %c0_39] : memref<1152x128xbf16, #tpu.memory_space<vmem>>, vector<128x128xbf16>
    %cst_40 = arith.constant dense<0.000000e+00> : vector<144x128xf32>
    %55 = tpu.matmul %53, %54, %cst_40 {dimension_numbers = #tpu.dot_dimension_numbers<[1], [0], [0], [1], [0, 0, 1, 1], [], []>} : vector<144x128xbf16>, vector<128x128xbf16>, vector<144x128xf32> -> vector<144x128xf32>
    %56 = arith.addf %52, %55 : vector<144x128xf32>
    %c45 = arith.constant 45 : index
    %c0_41 = arith.constant 0 : index
    %57 = vector.load %arg10[%c45, %c0_41] : memref<196x128xbf16, #tpu.memory_space<vmem>>, vector<144x128xbf16>
    %c1024 = arith.constant 1024 : index
    %c0_42 = arith.constant 0 : index
    %58 = vector.load %arg5[%c1024, %c0_42] : memref<1152x128xbf16, #tpu.memory_space<vmem>>, vector<128x128xbf16>
    %cst_43 = arith.constant dense<0.000000e+00> : vector<144x128xf32>
    %59 = tpu.matmul %57, %58, %cst_43 {dimension_numbers = #tpu.dot_dimension_numbers<[1], [0], [0], [1], [0, 0, 1, 1], [], []>} : vector<144x128xbf16>, vector<128x128xbf16>, vector<144x128xf32> -> vector<144x128xf32>
    %60 = arith.addf %56, %59 : vector<144x128xf32>
    %c2 = arith.constant 2 : index
    %c0_44 = arith.constant 0 : index
    %61 = vector.load %arg8[%c2, %c0_44] : memref<6x128xf32, #tpu.memory_space<vmem>>, vector<1x128xf32>
    %62 = vector.broadcast %61 : vector<1x128xf32> to vector<144x128xf32>
    %63 = arith.mulf %60, %62 : vector<144x128xf32>
    %c3 = arith.constant 3 : index
    %c0_45 = arith.constant 0 : index
    %64 = vector.load %arg8[%c3, %c0_45] : memref<6x128xf32, #tpu.memory_space<vmem>>, vector<1x128xf32>
    %65 = vector.broadcast %64 : vector<1x128xf32> to vector<144x128xf32>
    %66 = arith.addf %63, %65 : vector<144x128xf32>
    %c0_46 = arith.constant 0 : index
    %c0_47 = arith.constant 0 : index
    %c0_48 = arith.constant 0 : index
    %67 = vector.load %arg3[%c0_46, %c0_47, %c0_48] : memref<1x144x128xbf16, #tpu.memory_space<vmem>>, vector<1x144x128xbf16>
    %68 = vector.shape_cast %67 : vector<1x144x128xbf16> to vector<144x128xbf16>
    %c0_49 = arith.constant 0 : index
    %c0_50 = arith.constant 0 : index
    %69 = vector.load %arg6[%c0_49, %c0_50] : memref<128x128xbf16, #tpu.memory_space<vmem>>, vector<128x128xbf16>
    %cst_51 = arith.constant dense<0.000000e+00> : vector<144x128xf32>
    %70 = tpu.matmul %68, %69, %cst_51 {dimension_numbers = #tpu.dot_dimension_numbers<[1], [0], [0], [1], [0, 0, 1, 1], [], []>} : vector<144x128xbf16>, vector<128x128xbf16>, vector<144x128xf32> -> vector<144x128xf32>
    %c4 = arith.constant 4 : index
    %c0_52 = arith.constant 0 : index
    %71 = vector.load %arg8[%c4, %c0_52] : memref<6x128xf32, #tpu.memory_space<vmem>>, vector<1x128xf32>
    %72 = vector.broadcast %71 : vector<1x128xf32> to vector<144x128xf32>
    %73 = arith.mulf %70, %72 : vector<144x128xf32>
    %c5 = arith.constant 5 : index
    %c0_53 = arith.constant 0 : index
    %74 = vector.load %arg8[%c5, %c0_53] : memref<6x128xf32, #tpu.memory_space<vmem>>, vector<1x128xf32>
    %75 = vector.broadcast %74 : vector<1x128xf32> to vector<144x128xf32>
    %76 = arith.addf %73, %75 : vector<144x128xf32>
    %77 = arith.addf %66, %76 : vector<144x128xf32>
    %cst_54 = arith.constant 0.000000e+00 : f32
    %78 = vector.broadcast %cst_54 : f32 to vector<144x128xf32>
    %79 = arith.maximumf %77, %78 : vector<144x128xf32>
    %80 = arith.truncf %79 : vector<144x128xf32> to vector<144x128xbf16>
    %c0_55 = arith.constant 0 : index
    %c0_56 = arith.constant 0 : index
    %c0_57 = arith.constant 0 : index
    %81 = vector.load %arg9[%c0_55, %c0_56, %c0_57] : memref<1x144x128xbf16, #tpu.memory_space<vmem>>, vector<1x144x128xbf16>
    %82 = vector.shape_cast %81 : vector<1x144x128xbf16> to vector<144x128xbf16>
    %83 = vector.shape_cast %80 : vector<144x128xbf16> to vector<1x144x128xbf16>
    tpu.vector_store %arg9[%c0_55, %c0_56, %c0_57], %83 {strides = array<i32>} : memref<1x144x128xbf16, #tpu.memory_space<vmem>>, vector<1x144x128xbf16>,
    return
  }
  func.func @transform_0(%arg0: i32, %arg1: i32) -> (i32, i32, i32) {
    %c0_i32 = arith.constant 0 : i32
    %c0_i32_0 = arith.constant 0 : i32
    %c0_i32_1 = arith.constant 0 : i32
    return %arg0, %c0_i32, %c0_i32_0 : i32, i32, i32
  }
  func.func @transform_1(%arg0: i32, %arg1: i32) -> (i32, i32, i32) {
    %c0_i32 = arith.constant 0 : i32
    %c0_i32_0 = arith.constant 0 : i32
    return %arg0, %arg1, %c0_i32 : i32, i32, i32
  }
  func.func @transform_2(%arg0: i32, %arg1: i32) -> (i32, i32) {
    %c0_i32 = arith.constant 0 : i32
    %c0_i32_0 = arith.constant 0 : i32
    %c0_i32_1 = arith.constant 0 : i32
    return %c0_i32, %c0_i32_0 : i32, i32
  }
  func.func @transform_3(%arg0: i32, %arg1: i32) -> (i32, i32) {
    %c0_i32 = arith.constant 0 : i32
    %c0_i32_0 = arith.constant 0 : i32
    %c0_i32_1 = arith.constant 0 : i32
    return %c0_i32, %c0_i32_0 : i32, i32
  }
  func.func @transform_4(%arg0: i32, %arg1: i32) -> (i32, i32) {
    %c0_i32 = arith.constant 0 : i32
    %c0_i32_0 = arith.constant 0 : i32
    %c0_i32_1 = arith.constant 0 : i32
    return %c0_i32, %c0_i32_0 : i32, i32
  }
  func.func @transform_5(%arg0: i32, %arg1: i32) -> (i32, i32) {
    %c0_i32 = arith.constant 0 : i32
    %c0_i32_0 = arith.constant 0 : i32
    %c0_i32_1 = arith.constant 0 : i32
    return %c0_i32, %c0_i32_0 : i32, i32
  }
  func.func @transform_6(%arg0: i32, %arg1: i32) -> (i32, i32) {
    %c0_i32 = arith.constant 0 : i32
    %c0_i32_0 = arith.constant 0 : i32
    %c0_i32_1 = arith.constant 0 : i32
    return %c0_i32, %c0_i32_0 : i32, i32
  }
  func.func @transform_7(%arg0: i32, %arg1: i32) -> (i32, i32, i32) {
    %c0_i32 = arith.constant 0 : i32
    %c0_i32_0 = arith.constant 0 : i32
    return %arg0, %arg1, %c0_i32 : i32, i32, i32
  }
}

</mosaic_0001>

<bundles_post_ra>
// kernel: tpu_custom_call.1
= control target key start
LH: loop header
LB: loop body
LE: loop exit
PB: predicated region body
PF: predicated region fallthrough
CT: control target
= control target key end

     0   :  { %12 = vsyncpa [#allocation4], 0  ;;  %s7384_s0 = inlined_call_operand.vmem [shape: bf16[2,324,128], index: 0, kind: input, shape index: {}]   ;;  %s7385_s1 = inlined_call_operand.vmem [shape: bf16[2,288,128], index: 1, kind: input, shape index: {}]   ;;  %s7386_s2 = inlined_call_operand.vmem [shape: bf16[128,128], index: 2, kind: input, shape index: {}]   ;;  %s7387_s3 = inlined_call_operand.vmem [shape: bf16[1152,128], index: 3, kind: input, shape index: {}]   ;;  %s7388_s4 = inlined_call_operand.vmem [shape: bf16[128,128], index: 4, kind: input, shape index: {}]   ;;  %s7389_s5 = inlined_call_operand.vmem [shape: f32[324,1], index: 5, kind: input, shape index: {}]   ;;  %s7390_s6 = inlined_call_operand.vmem [shape: f32[6,128], index: 6, kind: input, shape index: {}]   ;;  %s7391_s7 = inlined_call_operand.hbm [shape: bf16[2,288,128], index: 7, kind: output, shape index: {}]  }
   0x1   :  { %14 = vsyncpa [#allocation4 + $0x1], 0  ;;  %s5829_s24 = smov 0   ;;  %s5831_s25 = smov 0  }
   0x2   :  { %s5833_s26 = smov 0   ;;  %s5835_s27 = smov 0  }
   0x3   :  { %s5837_s28 = smov 0   ;;  %s5839_s29 = smov 0  }
   0x4   :  { %s5841_s30 = smov 0   ;;  %s5843_s8 = smov 0  }
   0x5 LB: > { %7397 = sst [smem:[#allocation6_spill]] %s5777_s30  ;;  %s4045_s9 = sadd.s32 4294967295, %s5781_s8   ;;  %s5781_s8 = sphi %s5843_s8, %s20_s8   ;;  %s5777_s30 = sphi %s5841_s30, %s7406_s30   ;;  %s5773_s29 = sphi %s5839_s29, %s7411_s29   ;;  %s5769_s28 = sphi %s5837_s28, %s7404_s28   ;;  %s5765_s27 = sphi %s5835_s27, %s7410_s27   ;;  %s5761_s26 = sphi %s5833_s26, %s7409_s26   ;;  %s5757_s25 = sphi %s5831_s25, %s7408_s25   ;;  %s5753_s24 = sphi %s5829_s24, %s7407_s24  }
   0x6   : > { %s4046_s10 = sadd.s32 4294967294, %s5781_s8   ;;  %s29_s11 = sadd.s32 1, %s5773_s29 }
   0x7   : > { %p30_p0 = scmp.ge.s32.totalorder %s29_s11, 2  ;;  %s32_s12 = sadd.s32 1, %s5777_s30 }
   0x8   : > { %p210_p1 = scmp.ne.s32.totalorder %s5761_s26, %s5757_s25  ;;  %p211_p2 = scmp.eq.s32.totalorder %s4045_s9, 3 }
   0x9   : > { %s7413_s11 = smov (%p30_p0, %s29_s11), 0  ;;  %s7415_s12 = smov (!%p30_p0, %s32_s12), %s5777_s30 }
   0xa   : > { %7398 = sst [smem:[#allocation7_spill]] %s7413_s11  ;;  %s196_s13 = ssub.s32 %s5773_s29, %s7413_s11 }
   0xb   : > { %p5880_p3 = por %p211_p2, %p210_p1  ;;  %p34_p4 = scmp.ge.s32.totalorder %s7415_s12, 2 }
   0xc   : > { %p216_p5 = scmp.ne.s32.totalorder %s5757_s25, %s5753_s24  ;;  %p217_p6 = scmp.eq.s32.totalorder %s4046_s10, 3 }
   0xd   : > { %p4049_p7 = scmp.ge.s32.totalorder %s5781_s8, 1  ;;  %s7417_s12 = smov (%p34_p4, %s7415_s12), 0 }
   0xe   : > { %7400 = sst [smem:[#allocation8_spill]] %s7417_s12  ;;  %p5889_p8 = por %p217_p6, %p216_p5 }
   0xf   : > { %p271_p9 = scmp.lt.s32.totalorder %s5781_s8, 5  ;;  %s195_s16 = ssub.s32 %s5777_s30, %s7417_s12 }
  0x10   : > { %s200_s17 = sadd.s32 1, %s5761_s26  ;;  %s197_s18 = sor.u32 %s196_s13, %s195_s16 }
  0x11   : > { %p272_p10 = pnand %p4049_p7, %p271_p9  ;;  %p198_p11 = scmp.eq.s32.totalorder %s197_s18, 0 }
  0x12   : > { %v5525_v0 = vld [vmem:[%s7386_s2] sm:$0xff] (!%p272_p10)   ;;  %p312_p12 = scmp.lt.s32.totalorder (!%p272_p10), %s5769_s28, 1  ;;  %v5526_v1 = vld [vmem:[%s7386_s2 + $0x8] sm:$0xff] (!%p272_p10)   ;;  %s329_s9 = smul.u32 (!%p272_p10), 144, %s5765_s27  ;;  %v5527_v2 = vld [vmem:[%s7386_s2 + $0x10] sm:$0xff] (!%p272_p10)   ;;  %v5783_v4 = vmov (!%p272_p10), 0  }
  0x13   : > { %s5898_s19 = scalar_select %p198_p11, %s5761_s26, %s200_s17  }
  0x14   : > { %275 = sbr.rel (%p272_p10) target bundleno = 918 (0x396), region = 48  ;;  %4609 = vmatprep.subr.bf16.mxu0 (!%p272_p10), %v5525_v0  ;;  %s330_s13 = sshra.s32 (!%p272_p10), %s329_s9, 3  ;;  %v5528_v3 = vld [vmem:[%s7386_s2 + $0x18] sm:$0xff] (!%p272_p10)   ;;  %5523 = vset.pattern.permute.xlu0 (!%p272_p10), %v5783_v4  ;;  %860 = vst [vmem:[#allocation2] sm:$0xf] (!%p272_p10), %v5783_v4  ;;  %v5529_v6 = vld [vmem:[%s7386_s2 + $0x20] sm:$0xff] (!%p272_p10)  }
  0x15   : > { %4610 = vmatpush3.bf16.msra.mxu0 (!%p272_p10), %v5525_v0  ;;  %s4052_s20 = sshll.u32 (!%p272_p10), %s330_s13, 2  ;;  %5524 = vset.pattern.permute.xlu1 (!%p272_p10), %v5783_v4  ;;  %v5530_v7 = vld [vmem:[%s7386_s2 + $0x28] sm:$0xff] (!%p272_p10)   ;;  %v5531_v9 = vld [vmem:[%s7386_s2 + $0x30] sm:$0xff] (!%p272_p10)   ;;  %v5532_v13 = vld [vmem:[%s7386_s2 + $0x38] sm:$0xff] (!%p272_p10)   ;;  %v5784_v31 = vmov (!%p272_p10), 0.0   ;;  %vm5785_vm0 = vmmov (!%p272_p10), 0  }
  0x16   : > { %4611 = vmatprep.subr.bf16.mxu0 (!%p272_p10), %v5526_v1  ;;  %4805 = vmatprep.subr.bf16.mxu1 (!%p272_p10), %v5784_v31  ;;  %v5545_v34 = vld [vmem:[%s7387_s3 + $0x40] sm:$0xff] (!%p272_p10)   ;;  %v5546_v37 = vld [vmem:[%s7387_s3 + $0x48] sm:$0xff] (!%p272_p10)   ;;  %v5547_v47 = vld [vmem:[%s7387_s3 + $0x50] sm:$0xff] (!%p272_p10)   ;;  %vm1584_vm1 = vsmask.f32 (!%p272_p10), 7424  ;;  %vm2200_vm3 = vcmask (!%p272_p10), 1046528  }
  0x17   : > { %v5549_v48 = vld [vmem:[%s7387_s3 + $0x58] sm:$0xff] (!%p272_p10)   ;;  %v5548_v49 = vld [vmem:[%s7387_s3 + $0xc0] sm:$0xff] (!%p272_p10)   ;;  %v5550_v51 = vld [vmem:[%s7387_s3 + $0xc8] sm:$0xff] (!%p272_p10)   ;;  %4821 = vmatprep.mubr.msk.bf16.mxu1 (!%p272_p10), %vm5785_vm0, %v5784_v31  ;;  %vm1249_vm2 = vsmask.f32 (!%p272_p10), 4352  ;;  %vm3022_vm5 = vcmask (!%p272_p10), 1045504  }
  0x18   : > { %4806 = vmatpush3.bf16.msra.mxu1 (!%p272_p10), %v5548_v49  ;;  %v5551_v50 = vld [vmem:[%s7387_s3 + $0x60] sm:$0xff] (!%p272_p10)   ;;  %v5552_v52 = vld [vmem:[%s7387_s3 + $0x68] sm:$0xff] (!%p272_p10)   ;;  %v5553_v53 = vld [vmem:[%s7387_s3 + $0xd0] sm:$0xff] (!%p272_p10)   ;;  %vm2420_vm4 = vsmask.f32 (!%p272_p10), 6400  ;;  %s5786_s21 = smov (!%p272_p10), [#allocation3]  }
  0x19   : > { %4612 = vmatpush3.bf16.msra.mxu0 (!%p272_p10), %v5526_v1  ;;  %4807 = vmatprep.subr.bf16.mxu1 (!%p272_p10), %v5784_v31  ;;  %v5554_v54 = vld [vmem:[%s7387_s3 + $0x70] sm:$0xff] (!%p272_p10)   ;;  %v5555_v55 = vld [vmem:[%s7387_s3 + $0xd8] sm:$0xff] (!%p272_p10)   ;;  %v5557_v57 = vld [vmem:[%s7387_s3 + $0xe0] sm:$0xff] (!%p272_p10)   ;;  %vm3242_vm6 = vsmask.f32 (!%p272_p10), 5376  ;;  %s5691_s22 = sshll.u32 (!%p272_p10), %s5786_s21, 4  ;;  %s5692_s22 = int_to_ptr.vmem [resolvable:$false] %s5691_s22 }
  0x1a   : > { %4613 = vmatprep.subr.bf16.mxu0 (!%p272_p10), %v5527_v2  ;;  %v5556_v56 = vld [vmem:[%s7387_s3 + $0x78] sm:$0xff] (!%p272_p10)   ;;  %v5560_v58 = vld [vmem:[%s7387_s3 + $0xe8] sm:$0xff] (!%p272_p10)   ;;  %v5561_v59 = vld [vmem:[%s7387_s3 + $0xf0] sm:$0xff] (!%p272_p10)  }
  0x1b   : > { %s5909_s10 = scalar_select %p312_p12, %s5769_s28, 1  ;;  %v5564_v60 = vld [vmem:[%s7387_s3 + $0xf8] sm:$0xff]  }
  0x1c   : > { %4808 = vmatpush3.bf16.msra.mxu1 %v5550_v51 }
  0x1d   : > { %s5444_s18 = smul.u32 164, %s5909_s10  ;;  %4614 = vmatpush3.bf16.msra.mxu0 %v5527_v2  ;;  %4809 = vmatprep.subr.bf16.mxu1 %v5784_v31 }
  0x1e   : > { %4615 = vmatprep.subr.bf16.mxu0 %v5528_v3 }
  0x1f   : > { %s316_s11 = scalar_lea.vmem %s7384_s0, %s5444_s18 }
  0x20   : > { %s5921_s30 = scalar_lea.vmem %s316_s11, %s4052_s20  ;;  %s5933_s20 = scalar_lea.vmem %s7389_s5, %s329_s9  ;;  %4810 = vmatpush3.bf16.msra.mxu1 %v5553_v53 }
  0x21   : > { %v5533_v5 = vld [vmem:[%s5921_s30] sm:$0xff]   ;;  %4616 = vmatpush3.bf16.msra.mxu0 %v5528_v3  ;;  %v700_v8 = vld [vmem:[%s5933_s20 + $0x8] sm:$0xff]  ;;  %v702_v10 = vld [vmem:[%s5933_s20 + $0x18] sm:$0xff]  ;;  %4811 = vmatprep.subr.bf16.mxu1 %v5784_v31  ;;  %s5445_s9 = smul.u32 36, %s5909_s10 }
  0x22   : > { %4625 = vmatprep.mubr.bf16.mxu0 %v5533_v5  ;;  %4617 = vmatprep.subr.bf16.mxu0 %v5529_v6  ;;  %v701_v11 = vld [vmem:[%s5933_s20 + $0x10] sm:$0xff]  ;;  %v703_v12 = vld [vmem:[%s5933_s20 + $0x20] sm:$0xff]  ;;  %v704_v14 = vld [vmem:[%s5933_s20 + $0x28] sm:$0xff] }
  0x23   : > { %729 = vperm.xlu0 %5523, %v700_v8   ;;  %739 = vperm.xlu1 %5524, %v702_v10   ;;  %v705_v15 = vld [vmem:[%s5933_s20 + $0x30] sm:$0xff]  ;;  %v706_v16 = vld [vmem:[%s5933_s20 + $0x38] sm:$0xff]  ;;  %v5534_v17 = vld [vmem:[%s5921_s30 + $0x8] sm:$0xff]  }
  0x24   : > { %v707_v18 = vld [vmem:[%s5933_s20 + $0x40] sm:$0xff]  ;;  %v5535_v19 = vld [vmem:[%s5921_s30 + $0x10] sm:$0xff]   ;;  %v708_v20 = vld [vmem:[%s5933_s20 + $0x48] sm:$0xff]  ;;  %4812 = vmatpush3.bf16.msra.mxu1 %v5555_v55 }
  0x25   : > { %4618 = vmatpush3.bf16.msra.mxu0 %v5529_v6  ;;  %v709_v21 = vld [vmem:[%s5933_s20 + $0x50] sm:$0xff]  ;;  %v710_v22 = vld [vmem:[%s5933_s20 + $0x58] sm:$0xff]  ;;  %v711_v24 = vld [vmem:[%s5933_s20 + $0x60] sm:$0xff]  ;;  %4813 = vmatprep.subr.bf16.mxu1 %v5784_v31 }
  0x26   : > { %4619 = vmatprep.subr.bf16.mxu0 %v5530_v7  ;;  %v5536_v23 = vld [vmem:[%s5921_s30 + $0x18] sm:$0xff]   ;;  %v5537_v25 = vld [vmem:[%s5921_s30 + $0x20] sm:$0xff]   ;;  %v712_v26 = vld [vmem:[%s5933_s20 + $0x68] sm:$0xff] }
  0x27   : > { %734 = vperm.xlu0 %5523, %v701_v11   ;;  %744 = vperm.xlu1 %5524, %v703_v12   ;;  %v713_v27 = vld [vmem:[%s5933_s20 + $0x70] sm:$0xff]  ;;  %v714_v28 = vld [vmem:[%s5933_s20 + $0x78] sm:$0xff]  ;;  %v5538_v29 = vld [vmem:[%s5921_s30 + $0x28] sm:$0xff]  }
  0x28   : > { %v715_v30 = vld [vmem:[%s5933_s20 + $0x80] sm:$0xff]  ;;  %v5539_v32 = vld [vmem:[%s5921_s30 + $0x30] sm:$0xff]   ;;  %v716_v33 = vld [vmem:[%s5933_s20 + $0x88] sm:$0xff]  ;;  %4814 = vmatpush3.bf16.msra.mxu1 %v5557_v57 }
  0x29   : > { %4620 = vmatpush3.bf16.msra.mxu0 %v5530_v7  ;;  %v717_v35 = vld [vmem:[%s5933_s20 + $0x90] sm:$0xff]  ;;  %v699_v36 = vld [vmem:[%s5933_s20] sm:$0xff]  ;;  %v5540_v38 = vld [vmem:[%s5921_s30 + $0x38] sm:$0xff]   ;;  %4815 = vmatprep.subr.bf16.mxu1 %v5784_v31 }
  0x2a   : > { %4621 = vmatprep.subr.bf16.mxu0 %v5531_v9  ;;  %v718_v39 = vld [vmem:[%s5933_s20 + $0x98] sm:$0xff]  ;;  %v5541_v40 = vld [vmem:[%s5921_s30 + $0x40] sm:$0xff]   ;;  %v720_v42 = vld [vmem:[%s5933_s20 + $0xa8] sm:$0xff] }
  0x2b   : > { %749 = vperm.xlu0 %5523, %v704_v14   ;;  %754 = vperm.xlu1 %5524, %v705_v15   ;;  %v719_v41 = vld [vmem:[%s5933_s20 + $0xa0] sm:$0xff]  ;;  %v721_v43 = vld [vmem:[%s5933_s20 + $0xb0] sm:$0xf]  ;;  %v5542_v44 = vld [vmem:[%s5921_s30 + $0x48] sm:$0xff]   ;;  %s6826_s20 = smul.u32 18, %s5765_s27 }
  0x2c   : > { %v5543_v45 = vld [vmem:[%s5921_s30 + $0x50] sm:$0xff]   ;;  %v5544_v46 = vld [vmem:[%s5921_s30 + $0x58] ss:$0 sps:$4 sm:$0x33]   ;;  %4816 = vmatpush3.bf16.msra.mxu1 %v5560_v58  ;;  %v6058_v7 = vld [vmem:[%s7390_s6] ss:$0 sm:$0xff] }
  0x2d   : > { %4622 = vmatpush3.bf16.msra.mxu0 %v5531_v9  ;;  %4817 = vmatprep.subr.bf16.mxu1 %v5784_v31  ;;  %v6063_v10 = vld [vmem:[%s7390_s6 + $0x1] ss:$0 sm:$0xff]  ;;  %p320_p13 = scmp.lt.s32.totalorder %s6826_s20, 35  ;;  %s309_s30 = sand.u32 1, %s5757_s25  }
  0x2e   : > { %4623 = vmatprep.subr.bf16.mxu0 %v5532_v13  ;;  %s5443_s23 = smul.u32 72, %s309_s30  ;;  %s7332_s11 = scalar_lea.sflag [#allocation4], %s309_s30 }
  0x2f   : > { %759 = vperm.xlu0 %5523, %v706_v16   ;;  %764 = vperm.xlu1 %5524, %v707_v18   ;;  %s321_s27 = scalar_select %p320_p13, %s6826_s20, 35 }
  0x30   : > { %4818 = vmatpush3.bf16.msra.mxu1 %v5561_v59 }
  0x31   : > { %4624 = vmatpush3.bf16.msra.mxu0 %v5532_v13  ;;  %4819 = vmatprep.subr.bf16.mxu1 %v5784_v31  ;;  %s323_s13 = sadd.s32 %s5445_s9, %s321_s27  ;;  %s7210_s27 = scalar_lea.vmem [#allocation3], %s5443_s23 }
  0x32   : > { %4649 = vmatprep.subr.bf16.mxu0 %v5784_v31  ;;  %s4051_s12 = sshll.u32 %s323_s13, 2  ;;  %s5446_s13 = smul.u32 36, %s5769_s28 }
  0x33   : > { %769 = vperm.xlu0 %5523, %v708_v20   ;;  %774 = vperm.xlu1 %5524, %v709_v21   ;;  %s6848_s18 = scalar_lea.vmem %s7385_s1, %s4051_s12  ;;  %s5693_s9 = scalar_lea.vmem %s5692_s22, 2304 }
  0x34   : > { %4626 = vmatmul.mubr.bf16.vlgmr.msra.gmra.mrb[0].mxu0 %v5534_v17  ;;  %4820 = vmatpush3.bf16.msra.mxu1 %v5564_v60  ;;  %s3944_s12 = sadd.s32 %s5446_s13, %s6826_s20 }
  0x35   : > { %4629 = vmatprep.mubr.bf16.mxu0 %v5535_v19  ;;  %4650 = vmatpush3.bf16.msra.mxu0 %v5545_v34  ;;  %s4262_s10 = sshll.u32 %s3944_s12, 6 }
  0x36   : > { %4651 = vmatprep.subr.bf16.mxu0 %v5784_v31  ;;  %4857 = vmatprep.subr.bf16.mxu1 %v5784_v31  ;;  %s7327_s17 = scalar_lea.hbm %s7391_s7, %s4262_s10 }
  0x37   : > { %779 = vperm.xlu0 %5523, %v710_v22   ;;  %784 = vperm.xlu1 %5524, %v711_v24  }
  0x39   : > { %4652 = vmatpush3.bf16.msra.mxu0 %v5546_v37 }
  0x3a   : > { %4653 = vmatprep.subr.bf16.mxu0 %v5784_v31 }
  0x3b   : > { %789 = vperm.xlu0 %5523, %v712_v26   ;;  %794 = vperm.xlu1 %5524, %v713_v27  }
  0x3c   : > { %4630 = vmatmul.mubr.bf16.gmra.mrb[4].mxu0 %v5536_v23 }
  0x3d   : > { %4633 = vmatprep.mubr.bf16.mxu0 %v5537_v25  ;;  %4654 = vmatpush3.bf16.msra.mxu0 %v5547_v47 }
  0x3e   : > { %4655 = vmatprep.subr.bf16.mxu0 %v5784_v31 }
  0x3f   : > { %799 = vperm.xlu0 %5523, %v714_v28   ;;  %804 = vperm.xlu1 %5524, %v715_v30  }
  0x41   : > { %4656 = vmatpush3.bf16.msra.mxu0 %v5549_v48 }
  0x42   : > { %4657 = vmatprep.subr.bf16.mxu0 %v5784_v31 }
  0x43   : > { %809 = vperm.xlu0 %5523, %v716_v33   ;;  %814 = vperm.xlu1 %5524, %v717_v35  }
  0x44   : > { %4634 = vmatmul.mubr.bf16.gmra.mrb[8].mxu0 %v5538_v29 }
  0x45   : > { %4637 = vmatprep.mubr.bf16.mxu0 %v5539_v32  ;;  %4658 = vmatpush3.bf16.msra.mxu0 %v5551_v50 }
  0x46   : > { %4659 = vmatprep.subr.bf16.mxu0 %v5784_v31 }
  0x47   : > { %724 = vperm.xlu0 %5523, %v699_v36   ;;  %819 = vperm.xlu1 %5524, %v718_v39  }
  0x49   : > { %4660 = vmatpush3.bf16.msra.mxu0 %v5552_v52 }
  0x4a   : > { %4661 = vmatprep.subr.bf16.mxu0 %v5784_v31 }
  0x4b   : > { %824 = vperm.xlu0 %5523, %v719_v41   ;;  %829 = vperm.xlu1 %5524, %v720_v42  }
  0x4c   : > { %4638 = vmatmul.mubr.bf16.gmra.mrb[12].mxu0 %v5540_v38 }
  0x4d   : > { %4641 = vmatprep.mubr.bf16.mxu0 %v5541_v40  ;;  %4662 = vmatpush3.bf16.msra.mxu0 %v5554_v54 }
  0x4e   : > { %4663 = vmatprep.subr.bf16.mxu0 %v5784_v31 }
  0x4f   : > { %834 = vperm.xlu0 %5523, %v721_v43  }
  0x51   : > { %4664 = vmatpush3.bf16.msra.mxu0 %v5556_v56 }
  0x52   : > { %4701 = vmatprep.subr.bf16.mxu0 %v5784_v31 }
  0x54   : > { %4642 = vmatmul.mubr.bf16.gmra.mrb[16].mxu0 %v5542_v44 }
  0x55   : > { %4645 = vmatprep.mubr.bf16.mxu0 %v5543_v45 }
  0x5c   : > { %4646 = vmatmul.mubr.bf16.gmra.mrb[20].mxu0 %v5544_v46 }
  0x5d   : > { %4665 = vmatprep.mubr.msk.bf16.mxu0 %vm5785_vm0, %v5784_v31 }
  0xa2   : > { %v730_v61 = vpop.permute.xlu0 %729  ;;  %v740_v3 = vpop.permute.xlu1 %739 }
  0xa6   : > { %v735_v62 = vpop.permute.xlu0 %734  ;;  %v745_v5 = vpop.permute.xlu1 %744 }
  0xaa   : > { %v750_v63 = vpop.permute.xlu0 %749  ;;  %v755_v8 = vpop.permute.xlu1 %754 }
  0xae   : > { %v6045_v0 = vpop.permute.xlu0 %759  ;;  %v765_v24 = vpop.permute.xlu1 %764 }
  0xb2   : > { %v6047_v1 = vpop.permute.xlu0 %769  ;;  %v775_v45 = vpop.permute.xlu1 %774 }
  0xb6   : > { %v6049_v2 = vpop.permute.xlu0 %779 }
  0xba   : > { %v6051_v4 = vpop.permute.xlu0 %789 }
  0xbe   : > { %v6053_v6 = vpop.permute.xlu0 %799 }
  0xc2   : > { %v6065_v11 = vpop.permute.xlu0 %809 }
  0xc6   : > { %v725_v25 = vpop.permute.xlu0 %724 }
 0x107   : > { %v4627_v9 = vpop.f32.mrb[0].mxu0 }
 0x108   : > { %v626_v12 = vmul.f32 %v4627_v9, %v6058_v7  ;;  %v525_v13 = vpop.f32.mrb[1].mxu0 }
 0x109   : > { %v624_v14 = vmul.f32 %v6058_v7, %v525_v13  ;;  %v4628_v15 = vpop.f32.mrb[2].mxu0 }
 0x10a   : > { %v654_v16 = vadd.f32 %v6063_v10, %v626_v12  ;;  %v528_v17 = vpop.f32.mrb[3].mxu0  ;;  %v627_v19 = vmul.f32 %v4628_v15, %v6058_v7 }
 0x10b   : > { %v652_v18 = vadd.f32 %v6063_v10, %v624_v14  ;;  %v625_v20 = vmul.f32 %v6058_v7, %v528_v17 }
 0x10c   : > { %v677_v21 = vmax.f32 %v654_v16, 0.0  ;;  %v655_v27 = vadd.f32 %v6063_v10, %v627_v19  ;;  %v979_v19 = vld [vmem:[#allocation2] sm:$0x8] }
 0x10d   : > { %v675_v22 = vmax.f32 %v652_v18, 0.0  ;;  %v653_v23 = vadd.f32 %v6063_v10, %v625_v20 }
 0x10e   : > { %v839_v33 = vmul.f32 %v735_v62, %v677_v21  ;;  %v678_v41 = vmax.f32 %v655_v27, 0.0 }
 0x10f   : > { %v837_v26 = vmul.f32 %v725_v25, %v675_v22  ;;  %v676_v28 = vmax.f32 %v653_v23, 0.0  ;;  %v4631_v29 = vpop.f32.mrb[4].mxu0 }
 0x110   : > { %v630_v30 = vmul.f32 %v4631_v29, %v6058_v7  ;;  %v541_v32 = vpop.f32.mrb[5].mxu0  ;;  %v840_v50 = vmul.f32 %v740_v3, %v678_v41 }
 0x111   : > { %v4265_v34 = vpack.c.bf16 %v837_v26, %v837_v26  ;;  %v838_v35 = vmul.f32 %v730_v61, %v676_v28  ;;  %v628_v36 = vmul.f32 %v6058_v7, %v541_v32  ;;  %v4632_v37 = vpop.f32.mrb[6].mxu0  ;;  %v6085_v61 = vpop.permute.xlu1 %784 }
 0x112   : > { %v658_v38 = vadd.f32 %v6063_v10, %v630_v30  ;;  %v631_v39 = vmul.f32 %v4632_v37, %v6058_v7  ;;  %v544_v40 = vpop.f32.mrb[7].mxu0 }
 0x113   : > { %956 = vst [vmem:[#allocation2 + $0x4] sm:$0xf] %v4265_v34  ;;  %v4309_v42 = vpack.c.bf16 %v839_v33, %v838_v35  ;;  %v656_v43 = vadd.f32 %v6063_v10, %v628_v36  ;;  %v629_v44 = vmul.f32 %v6058_v7, %v544_v40 }
 0x114   : > { %v681_v46 = vmax.f32 %v658_v38, 0.0  ;;  %v659_v49 = vadd.f32 %v6063_v10, %v631_v39 }
 0x115   : > { %4401 = vst [vmem:[#allocation2 + $0x8] sm:$0xff] %v4309_v42   ;;  %v679_v47 = vmax.f32 %v656_v43, 0.0  ;;  %v657_v48 = vadd.f32 %v6063_v10, %v629_v44  ;;  %v795_v28 = vpop.permute.xlu1 %794 }
 0x116   : > { %v843_v56 = vmul.f32 %v755_v8, %v681_v46  ;;  %v682_v62 = vmax.f32 %v659_v49, 0.0 }
 0x117   : > { %v841_v51 = vmul.f32 %v745_v5, %v679_v47  ;;  %v680_v52 = vmax.f32 %v657_v48, 0.0  ;;  %v4635_v53 = vpop.f32.mrb[8].mxu0 }
 0x118   : > { %v634_v54 = vmul.f32 %v4635_v53, %v6058_v7  ;;  %v557_v55 = vpop.f32.mrb[9].mxu0  ;;  %v844_v21 = vmul.f32 %v6045_v0, %v682_v62  ;;  %v5584_v0 = vld [vmem:[%s7387_s3 + $0x8] sm:$0xff]  }
 0x119   : > { %v4314_v57 = vpack.c.bf16 %v841_v51, %v840_v50  ;;  %v842_v58 = vmul.f32 %v750_v63, %v680_v52  ;;  %v632_v59 = vmul.f32 %v6058_v7, %v557_v55  ;;  %v4636_v60 = vpop.f32.mrb[10].mxu0  ;;  %v5583_v63 = vld [vmem:[%s7387_s3] sm:$0xff]   ;;  %v5588_v50 = vld [vmem:[%s7387_s3 + $0x10] sm:$0xff]  }
 0x11a   : > { %v662_v9 = vadd.f32 %v6063_v10, %v634_v54  ;;  %v560_v12 = vpop.f32.mrb[11].mxu0  ;;  %v635_v13 = vmul.f32 %v4636_v60, %v6058_v7  ;;  %v980_v8 = vld [vmem:[#allocation2 + $0x4] sm:$0xf] }
 0x11b   : > { %4402 = vst [vmem:[#allocation2 + $0x10] sm:$0xff] %v4314_v57   ;;  %v4319_v3 = vpack.c.bf16 %v843_v56, %v842_v58  ;;  %v660_v5 = vadd.f32 %v6063_v10, %v632_v59  ;;  %v633_v14 = vmul.f32 %v6058_v7, %v560_v12  ;;  %v6098_v30 = vcombine.low %v979_v19, %v980_v8  ;;  %v805_v56 = vpop.permute.xlu1 %804 }
 0x11c   : > { %v981_v15 = vld [vmem:[#allocation2 + $0x8] sm:$0xf]  ;;  %v685_v16 = vmax.f32 %v662_v9, 0.0  ;;  %v663_v23 = vadd.f32 %v6063_v10, %v635_v13  ;;  %v982_v27 = vld [vmem:[#allocation2 + $0xc] sm:$0xf] }
 0x11d   : > { %4403 = vst [vmem:[#allocation2 + $0x18] sm:$0xff] %v4319_v3   ;;  %v683_v17 = vmax.f32 %v660_v5, 0.0  ;;  %v661_v18 = vadd.f32 %v6063_v10, %v633_v14  ;;  %v4098_v20 = vcombine.low %v980_v8, %v981_v15  ;;  %v1841_v37 = vld [vmem:[#allocation2 + $0xc] sm:$0xf]  ;;  %v6110_v42 = vcombine.low %v981_v15, %v982_v27 }
 0x11e   : > { %v686_v44 = vmax.f32 %v663_v23, 0.0  ;;  %v1251_v51 = vshrl.u32 %v6098_v30, 16  ;;  %v1254_v55 = vshll.u32 %v6098_v30, 16 }
 0x11f   : > { %v845_v22 = vmul.f32 %v765_v24, %v683_v17  ;;  %v684_v25 = vmax.f32 %v661_v18, 0.0  ;;  %v4639_v26 = vpop.f32.mrb[12].mxu0  ;;  %4666 = vmatmul.mubr.bf16.vlgmr.msra.gmra.mrb[24].mxu0 %v4098_v20  ;;  %v847_v24 = vmul.f32 %v775_v45, %v685_v16  ;;  %v1259_v58 = vshrl.u32 %v6110_v42, 16 }
 0x120   : > { %v638_v29 = vmul.f32 %v4639_v26, %v6058_v7  ;;  %v573_v32 = vpop.f32.mrb[13].mxu0  ;;  %4669 = vmatprep.mubr.msk.bf16.mxu0 %vm5785_vm0, %v5784_v31  ;;  %4702 = vmatpush3.bf16.msra.mxu0 %v5583_v63  ;;  %v1262_v59 = vshll.u32 %v6110_v42, 16  ;;  %v848_v62 = vmul.f32 %v6049_v2, %v686_v44  ;;  %v5590_v2 = vld [vmem:[%s7387_s3 + $0x18] sm:$0xff]   ;;  %v5572_v42 = vld [vmem:[%s7387_s3 + $0x108] sm:$0xff]  }
 0x121   : > { %v4324_v33 = vpack.c.bf16 %v845_v22, %v844_v21  ;;  %v846_v34 = vmul.f32 %v6047_v1, %v684_v25  ;;  %v636_v35 = vmul.f32 %v6058_v7, %v573_v32  ;;  %v4640_v36 = vpop.f32.mrb[14].mxu0  ;;  %4703 = vmatprep.subr.bf16.mxu0 %v5784_v31 }
 0x122   : > { %v666_v38 = vadd.f32 %v6063_v10, %v638_v29  ;;  %v639_v39 = vmul.f32 %v4640_v36, %v6058_v7  ;;  %v576_v40 = vpop.f32.mrb[15].mxu0  ;;  %v983_v41 = vld [vmem:[#allocation2 + $0x10] sm:$0xf]  ;;  %v984_v13 = vld [vmem:[#allocation2 + $0x14] sm:$0xf]  ;;  %v6164_v36 = vrot.slane %v1251_v51, 3 }
 0x123   : > { %v6112_v43 = vld [vmem:[#allocation2 + $0x10] sm:$0xf]  ;;  %4404 = vst [vmem:[#allocation2 + $0x20] sm:$0xff] %v4324_v33   ;;  %v4329_v45 = vpack.c.bf16 %v847_v24, %v846_v34  ;;  %v664_v1 = vadd.f32 %v6063_v10, %v636_v35  ;;  %v637_v46 = vmul.f32 %v6058_v7, %v576_v40  ;;  %v4099_v54 = vcombine.low %v982_v27, %v983_v41  ;;  %v815_v24 = vpop.permute.xlu1 %814  ;;  %v5594_v35 = vld [vmem:[%s7387_s3 + $0x20] sm:$0xff]  }
 0x124   : > { %v689_v47 = vmax.f32 %v666_v38, 0.0  ;;  %v4151_v48 = vcombine.low %v1841_v37, %v6112_v43  ;;  %v6117_v49 = vld [vmem:[#allocation2 + $0x14] sm:$0xff]   ;;  %4704 = vmatpush3.bf16.msra.mxu0 %v5584_v0  ;;  %v667_v57 = vadd.f32 %v6063_v10, %v639_v39  ;;  %v6151_v27 = vcombine.low %v983_v41, %v984_v13 }
 0x125   : > { %4405 = vst [vmem:[#allocation2 + $0x28] sm:$0xff] %v4329_v45   ;;  %v687_v52 = vmax.f32 %v664_v1, 0.0  ;;  %v665_v53 = vadd.f32 %v6063_v10, %v637_v46  ;;  %4705 = vmatprep.subr.bf16.mxu0 %v5784_v31  ;;  %v1932_v5 = vshll.u32 %v6117_v49, 16  ;;  %v6144_v21 = vld [vmem:[#allocation2 + $0x18] sm:$0xf]  ;;  %v6166_v37 = vrot.slane %v1254_v55, 4 }
 0x126   : > { %v1927_v60 = vshll.u32 %v4151_v48, 16  ;;  %v851_v14 = vmul.f32 %v795_v28, %v689_v47  ;;  %v1925_v63 = vshrl.u32 %v4151_v48, 16  ;;  %v690_v22 = vmax.f32 %v667_v57, 0.0  ;;  %v5596_v47 = vld [vmem:[%s7387_s3 + $0x28] sm:$0xff]   ;;  %v825_v48 = vpop.permute.xlu0 %824 }
 0x127   : > { %v849_v9 = vmul.f32 %v6085_v61, %v687_v52  ;;  %v688_v12 = vmax.f32 %v665_v53, 0.0  ;;  %v4643_v3 = vpop.f32.mrb[16].mxu0  ;;  %4670 = vmatmul.mubr.bf16.gmra.mrb[28].mxu0 %v4099_v54  ;;  %v6142_v20 = vrot.slane %v1932_v5, 1  ;;  %v4100_v41 = vcombine.low %v984_v13, %v6144_v21  ;;  %v820_v13 = vpop.permute.xlu1 %819 }
 0x128   : > { %v642_v8 = vmul.f32 %v4643_v3, %v6058_v7  ;;  %v589_v15 = vpop.f32.mrb[17].mxu0  ;;  %v1929_v16 = vrot.slane %v1927_v60, 1  ;;  %4673 = vmatprep.mubr.msk.bf16.mxu0 %vm5785_vm0, %v5784_v31  ;;  %4706 = vmatpush3.bf16.msra.mxu0 %v5588_v50  ;;  %v852_v44 = vmul.f32 %v6053_v6, %v690_v22  ;;  %v6175_v45 = vrot.slane %v1259_v58, 3  ;;  %v5576_v3 = vld [vmem:[%s7387_s3 + $0x110] sm:$0xff]  }
 0x129   : > { %v4334_v61 = vpack.c.bf16 %v849_v9, %v848_v62  ;;  %v850_v17 = vmul.f32 %v6051_v4, %v688_v12  ;;  %v640_v18 = vmul.f32 %v6058_v7, %v589_v15  ;;  %v4644_v19 = vpop.f32.mrb[18].mxu0  ;;  %4707 = vmatprep.subr.bf16.mxu0 %v5784_v31  ;;  %v5568_v4 = vld [vmem:[%s7387_s3 + $0x100] sm:$0xff]   ;;  %v6177_v1 = vrot.slane %v1262_v59, 4 }
 0x12a   : > { %v670_v23 = vadd.f32 %v6063_v10, %v642_v8  ;;  %v592_v25 = vpop.f32.mrb[19].mxu0  ;;  %v1930_v26 = vor.u32 %v1929_v16, %v1925_v63  ;;  %v6153_v28 = vld [vmem:[#allocation2 + $0x1c] sm:$0xff]   ;;  %v643_v32 = vmul.f32 %v4644_v19, %v6058_v7  ;;  %v1268_v46 = vshrl.u32 %v6151_v27, 16 }
 0x12b   : > { %4406 = vst [vmem:[#allocation2 + $0x30] sm:$0xff] %v4334_v61   ;;  %v4339_v29 = vpack.c.bf16 %v851_v14, %v850_v17  ;;  %v668_v30 = vadd.f32 %v6063_v10, %v640_v18  ;;  %v641_v0 = vmul.f32 %v6058_v7, %v592_v25  ;;  %v1940_v34 = vshll.u32 %v6153_v28, 16  ;;  %v987_v16 = vld [vmem:[#allocation2 + $0x20] sm:$0xf]  ;;  %v5601_v18 = vld [vmem:[%s7387_s3 + $0x30] sm:$0xff]   ;;  %v5582_v25 = vld [vmem:[%s7387_s3 + $0x118] sm:$0xff]  }
 0x12c   : > { %v1935_v33 = vsel %vm1584_vm1, %v1930_v26, %v6142_v20  ;;  %4708 = vmatpush3.bf16.msra.mxu0 %v5590_v2  ;;  %v693_v38 = vmax.f32 %v670_v23, 0.0  ;;  %v671_v51 = vadd.f32 %v6063_v10, %v643_v32  ;;  %v1936_v53 = vshrl.u32 %v6117_v49, 16  ;;  %v6188_v54 = vld [vmem:[#allocation2 + $0x24] sm:$0xff]  }
 0x12d   : > { %4407 = vst [vmem:[#allocation2 + $0x38] sm:$0xff] %v4339_v29   ;;  %v691_v39 = vmax.f32 %v668_v30, 0.0  ;;  %v669_v40 = vadd.f32 %v6063_v10, %v641_v0  ;;  %4822 = vmatmul.mubr.bf16.vlgmr.msra.gmra.mrb[0].mxu1 %v1935_v33  ;;  %4709 = vmatprep.subr.bf16.mxu0 %v5784_v31  ;;  %v1942_v58 = vrot.slane %v1940_v34, 1  ;;  %v1271_v8 = vshll.u32 %v6151_v27, 16  ;;  %v6212_v23 = vld [vmem:[#allocation2 + $0x24] sm:$0xf] }
 0x12e   : > { %4858 = vmatpush3.bf16.msra.mxu1 %v5568_v4  ;;  %4825 = vmatprep.mubr.msk.bf16.mxu1 %vm5785_vm0, %v5784_v31  ;;  %v855_v59 = vmul.f32 %v815_v24, %v693_v38  ;;  %v1938_v63 = vor.u32 %v1936_v53, %v6142_v20  ;;  %v1948_v20 = vshll.u32 %v6188_v54, 16  ;;  %v6221_v32 = vld [vmem:[#allocation2 + $0x28] sm:$0xf]  ;;  %v6228_v24 = vrot.slane %v1932_v5, 2 }
 0x12f   : > { %v853_v50 = vmul.f32 %v805_v56, %v691_v39  ;;  %v692_v52 = vmax.f32 %v669_v40, 0.0  ;;  %v4647_v6 = vpop.f32.mrb[20].mxu0  ;;  %4674 = vmatmul.mubr.bf16.gmra.mrb[32].mxu0 %v4100_v41  ;;  %4859 = vmatprep.subr.bf16.mxu1 %v5784_v31  ;;  %v986_v56 = vld [vmem:[#allocation2 + $0x1c] sm:$0xf]  ;;  %v6235_v40 = vrot.slane %v1936_v53, 1  ;;  %v830_v41 = vpop.permute.xlu1 %829 }
 0x130   : > { %v646_v55 = vmul.f32 %v4647_v6, %v6058_v7  ;;  %v605_v57 = vpop.f32.mrb[21].mxu0  ;;  %4677 = vmatprep.mubr.msk.bf16.mxu0 %vm5785_vm0, %v5784_v31  ;;  %4710 = vmatpush3.bf16.msra.mxu0 %v5594_v35  ;;  %v1943_v22 = vsel %vm1584_vm1, %v1938_v63, %v1942_v58  ;;  %v4101_v29 = vcombine.low %v986_v56, %v987_v16  ;;  %v6233_v35 = vld [vmem:[#allocation2 + $0x2c] sm:$0xf] }
 0x131   : > { %v4344_v60 = vpack.c.bf16 %v853_v50, %v852_v44  ;;  %v854_v62 = vmul.f32 %v6065_v11, %v692_v52  ;;  %v644_v9 = vmul.f32 %v6058_v7, %v605_v57  ;;  %v4648_v12 = vpop.f32.mrb[22].mxu0  ;;  %4711 = vmatprep.subr.bf16.mxu0 %v5784_v31  ;;  %v694_v11 = vmax.f32 %v671_v51, 0.0 }
 0x132   : > { %v674_v14 = vadd.f32 %v6063_v10, %v646_v55  ;;  %v608_v15 = vpop.f32.mrb[23].mxu0  ;;  %4860 = vmatpush3.bf16.msra.mxu1 %v5572_v42  ;;  %v6219_v30 = vcombine.low %v6144_v21, %v986_v56  ;;  %v6223_v0 = vld [vmem:[#allocation2 + $0x2c] sm:$0xff]   ;;  %v1950_v44 = vrot.slane %v1948_v20, 1  ;;  %v5589_v55 = vld [vmem:[%s7387_s3 + $0x120] sm:$0xff]   ;;  %v6264_v56 = vld [vmem:[#allocation2 + $0x34] sm:$0xf] }
 0x133   : > { %4408 = vst [vmem:[#allocation2 + $0x40] sm:$0xff] %v4344_v60   ;;  %v4349_v2 = vpack.c.bf16 %v855_v59, %v854_v62  ;;  %v672_v61 = vadd.f32 %v6063_v10, %v644_v9  ;;  %v645_v17 = vmul.f32 %v6058_v7, %v608_v15  ;;  %4861 = vmatprep.subr.bf16.mxu1 %v5784_v31  ;;  %v835_v7 = vpop.permute.xlu0 %834  ;;  %v1956_v6 = vshll.u32 %v6223_v0, 16  ;;  %v6258_v57 = vld [vmem:[#allocation2 + $0x30] sm:$0xf]  ;;  %v2180_v60 = vld [vmem:[#allocation2 + $0xc] sm:$0xe] }
 0x134   : > { %v697_v19 = vmax.f32 %v674_v14, 0.0  ;;  %4712 = vmatpush3.bf16.msra.mxu0 %v5596_v47  ;;  %v856_v21 = vmul.f32 %v820_v13, %v694_v11  ;;  %v6245_v47 = vcombine.low %v987_v16, %v6212_v23  ;;  %v1277_v52 = vshrl.u32 %v6219_v30, 16  ;;  %v6252_v53 = vld [vmem:[#allocation2 + $0x34] sm:$0xff]   ;;  %v6290_v11 = vld [vmem:[#allocation2 + $0x3c] sm:$0xf] }
 0x135   : > { %4409 = vst [vmem:[#allocation2 + $0x48] sm:$0xff] %v4349_v2   ;;  %v695_v26 = vmax.f32 %v672_v61, 0.0  ;;  %v673_v4 = vadd.f32 %v6063_v10, %v645_v17  ;;  %4826 = vmatmul.mubr.bf16.gmra.mrb[4].mxu1 %v1943_v22  ;;  %4713 = vmatprep.subr.bf16.mxu0 %v5784_v31  ;;  %v1944_v10 = vshrl.u32 %v6153_v28, 16  ;;  %v1257_v59 = vor.u32 %v6166_v37, %v6164_v36  ;;  %v6280_v15 = vld [vmem:[#allocation2 + $0x38] sm:$0xf]  ;;  %v5595_v2 = vld [vmem:[%s7387_s3 + $0x128] sm:$0xff]  }
 0x136   : > { %v859_v33 = vmul.f32 %v835_v7, %v697_v19  ;;  %4829 = vmatprep.mubr.msk.bf16.mxu1 %vm5785_vm0, %v5784_v31  ;;  %4862 = vmatpush3.bf16.msra.mxu1 %v5576_v3  ;;  %v1280_v9 = vshll.u32 %v6219_v30, 16  ;;  %v1952_v12 = vshrl.u32 %v6188_v54, 16  ;;  %v6273_v3 = vor.u32 %v6177_v1, %v6175_v45  ;;  %v5605_v30 = vld [vmem:[%s7387_s3 + $0x138] sm:$0xff]  }
 0x137   : > { %v857_v38 = vmul.f32 %v825_v48, %v695_v26  ;;  %v696_v39 = vmax.f32 %v673_v4, 0.0  ;;  %4678 = vmatmul.mubr.bf16.gmra.mrb[36].mxu0 %v4101_v29  ;;  %4863 = vmatprep.subr.bf16.mxu1 %v5784_v31  ;;  %v1946_v42 = vor.u32 %v1944_v10, %v1942_v58  ;;  %v5603_v48 = vld [vmem:[%s7387_s3 + $0x38] sm:$0xff]   ;;  %v6262_v58 = vcombine.low %v6221_v32, %v6233_v35  ;;  %v5602_v29 = vld [vmem:[%s7387_s3 + $0x130] sm:$0xff]  }
 0x138   : > { %v4287_v5 = vpack.c.bf16 %v859_v33, %v859_v33  ;;  %4681 = vmatprep.mubr.msk.bf16.mxu0 %vm5785_vm0, %v5784_v31  ;;  %4714 = vmatpush3.bf16.msra.mxu0 %v5601_v18  ;;  %v4102_v14 = vcombine.low %v6212_v23, %v6221_v32  ;;  %v1286_v36 = vshrl.u32 %v6245_v47, 16  ;;  %v1289_v37 = vshll.u32 %v6245_v47, 16 }
 0x139   : > { %v4354_v50 = vpack.c.bf16 %v857_v38, %v856_v21  ;;  %v858_v51 = vmul.f32 %v830_v41, %v696_v39  ;;  %4715 = vmatprep.subr.bf16.mxu0 %v5784_v31  ;;  %v1951_v13 = vsel %vm1584_vm1, %v1946_v42, %v1950_v44  ;;  %v1958_v63 = vrot.slane %v1956_v6, 1 }
 0x13a   : > { %978 = vst [vmem:[#allocation2 + $0x5c] sm:$0x3] %v4287_v5  ;;  %4864 = vmatpush3.bf16.msra.mxu1 %v5582_v25  ;;  %v1960_v45 = vshrl.u32 %v6223_v0, 16  ;;  %v1964_v1 = vshll.u32 %v6252_v53, 16  ;;  %v6288_v16 = vcombine.low %v6258_v57, %v6264_v56  ;;  %v6297_v61 = vcombine.low %v2180_v60, %v6112_v43  ;;  %v6302_v18 = vld [vmem:[#allocation2 + $0x3c] sm:$0xff]  }
 0x13b   : > { %4410 = vst [vmem:[#allocation2 + $0x50] sm:$0xff] %v4354_v50   ;;  %v4286_v62 = vpack.c.bf16 %v858_v51, %v858_v51  ;;  %4865 = vmatprep.subr.bf16.mxu1 %v5784_v31  ;;  %v1295_v17 = vshrl.u32 %v6262_v58, 16  ;;  %v6304_v19 = vld [vmem:[#allocation2 + $0x40] sm:$0xf]  ;;  %v1954_v22 = vor.u32 %v1952_v12, %v1950_v44  ;;  %v4103_v23 = vcombine.low %v6233_v35, %v6258_v57  ;;  %v6311_v43 = vld [vmem:[#allocation2 + $0x44] sm:$0xf] }
 0x13c   : > { %4716 = vmatpush3.bf16.msra.mxu0 %v5603_v48  ;;  %v6315_v25 = vsel %vm1249_vm2, %v1257_v59, %v6273_v3  ;;  %v1298_v7 = vshll.u32 %v6262_v58, 16  ;;  %v4104_v26 = vcombine.low %v6264_v56, %v6280_v15  ;;  %v4122_v4 = vcombine.low %v6280_v15, %v6290_v11  ;;  %v6337_v39 = vld [vmem:[#allocation2 + $0x48] sm:$0xf] }
 0x13d   : > { %977 = vst [vmem:[#allocation2 + $0x58] sm:$0xf] %v4286_v62  ;;  %4830 = vmatmul.mubr.bf16.gmra.mrb[8].mxu1 %v1951_v13  ;;  %4753 = vmatprep.subr.bf16.mxu0 %v5784_v31  ;;  %v1270_v32 = vrot.slane %v1268_v46, 3  ;;  %v1959_v33 = vsel %vm1584_vm1, %v1954_v22, %v1958_v63  ;;  %v1962_v35 = vor.u32 %v1960_v45, %v1958_v63  ;;  %v6334_v21 = vrot.slane %v1964_v1, 1  ;;  %v6369_v62 = vld [vmem:[#allocation2 + $0x44] sm:$0xff]  }
 0x13e   : > { %4833 = vmatprep.mubr.msk.bf16.mxu1 %vm5785_vm0, %v5784_v31  ;;  %4866 = vmatpush3.bf16.msra.mxu1 %v5589_v55  ;;  %v1304_v38 = vshrl.u32 %v6288_v16, 16  ;;  %v1307_v41 = vshll.u32 %v6288_v16, 16  ;;  %v4123_v5 = vcombine.low %v6304_v19, %v6311_v43  ;;  %v1273_v46 = vrot.slane %v1271_v8, 4 }
 0x13f   : > { %4682 = vmatmul.mubr.bf16.gmra.mrb[40].mxu0 %v4102_v14  ;;  %4867 = vmatprep.subr.bf16.mxu1 %v5784_v31  ;;  %v6346_v42 = vor.u32 %v6228_v24, %v6235_v40  ;;  %v1972_v44 = vshll.u32 %v6302_v18, 16  ;;  %v2201_v47 = vrot.slane %v6297_v61, 1  ;;  %v2202_v48 = vrot.slane %v6117_v49, 1 }
 0x140   : > { %4685 = vmatprep.mubr.msk.bf16.mxu0 %vm5785_vm0, %v5784_v31  ;;  %v1279_v50 = vrot.slane %v1277_v52, 3  ;;  %v1313_v51 = vshrl.u32 %v4122_v4, 16  ;;  %v4124_v27 = vcombine.low %v6337_v39, %v6337_v39  ;;  %v1274_v8 = vor.u32 %v1273_v46, %v1270_v32 }
 0x141   : > { %v1282_v55 = vrot.slane %v1280_v9, 4  ;;  %v1316_v24 = vshll.u32 %v4122_v4, 16  ;;  %v6357_v40 = vsel %vm2200_vm3, %v2201_v47, %v2202_v48  ;;  %v2204_v57 = vrot.slane %v6153_v28, 1 }
 0x142   : > { %4868 = vmatpush3.bf16.msra.mxu1 %v5595_v2  ;;  %v1288_v58 = vrot.slane %v1286_v36, 3  ;;  %v1322_v49 = vshrl.u32 %v4123_v5, 16  ;;  %v6367_v52 = vsel %vm1249_vm2, %v6273_v3, %v1274_v8  ;;  %v1291_v60 = vrot.slane %v1289_v37, 4  ;;  %v6381_v2 = vld [vmem:[#allocation2 + $0x4c] sm:$0xff]  }
 0x143   : > { %4869 = vmatprep.subr.bf16.mxu1 %v5784_v31  ;;  %v1283_v59 = vor.u32 %v1282_v55, %v1279_v50  ;;  %v1325_v9 = vshll.u32 %v4123_v5, 16  ;;  %v6373_v13 = vsel %vm2200_vm3, %v2202_v48, %v2204_v57  ;;  %v2206_v14 = vrot.slane %v6188_v54, 1  ;;  %v6393_v46 = vld [vmem:[#allocation2 + $0x54] ss:$0 sps:$4 sm:$0x11]  }
 0x144   : > { %v1297_v36 = vrot.slane %v1295_v17, 3  ;;  %v1331_v63 = vshrl.u32 %v4124_v27, 16  ;;  %v1334_v3 = vshll.u32 %v4124_v27, 16  ;;  %v1292_v37 = vor.u32 %v1291_v60, %v1288_v58 }
 0x145   : > { %4834 = vmatmul.mubr.bf16.gmra.mrb[12].mxu1 %v1959_v33  ;;  %v6379_v16 = vsel %vm1249_vm2, %v1274_v8, %v1283_v59  ;;  %v6384_v22 = vsel %vm2200_vm3, %v2204_v57, %v2206_v14  ;;  %v2208_v4 = vrot.slane %v6223_v0, 1  ;;  %v1967_v17 = vsel %vm1584_vm1, %v1962_v35, %v6334_v21 }
 0x146   : > { %4837 = vmatprep.mubr.msk.bf16.mxu1 %vm5785_vm0, %v5784_v31  ;;  %4870 = vmatpush3.bf16.msra.mxu1 %v5602_v29  ;;  %v1306_v29 = vrot.slane %v1304_v38, 3  ;;  %v6390_v32 = vsel %vm1249_vm2, %v1283_v59, %v1292_v37  ;;  %v1309_v33 = vrot.slane %v1307_v41, 4  ;;  %v2210_v5 = vrot.slane %v6252_v53, 1 }
 0x147   : > { %4686 = vmatmul.mubr.bf16.gmra.mrb[44].mxu0 %v4103_v23  ;;  %4871 = vmatprep.subr.bf16.mxu1 %v5784_v31  ;;  %v1300_v23 = vrot.slane %v1298_v7, 4  ;;  %v6397_v7 = vsel %vm2200_vm3, %v2206_v14, %v2208_v4  ;;  %v1315_v48 = vrot.slane %v1313_v51, 3  ;;  %v1318_v38 = vrot.slane %v1316_v24, 4 }
 0x148   : > { %4689 = vmatprep.mubr.msk.bf16.mxu0 %vm5785_vm0, %v5784_v31  ;;  %v1310_v50 = vor.u32 %v1309_v33, %v1306_v29  ;;  %v6400_v35 = vsel %vm2200_vm3, %v2208_v4, %v2210_v5  ;;  %v2212_v27 = vrot.slane %v6302_v18, 1  ;;  %v1324_v8 = vrot.slane %v1322_v49, 3 }
 0x149   : > { %v1301_v47 = vor.u32 %v1300_v23, %v1297_v36  ;;  %v1319_v55 = vor.u32 %v1318_v38, %v1315_v48  ;;  %v1327_v57 = vrot.slane %v1325_v9, 4  ;;  %v2214_v58 = vrot.slane %v6369_v62, 1 }
 0x14a   : > { %4872 = vmatpush3.bf16.msra.mxu1 %v5605_v30  ;;  %v6413_v24 = vsel %vm2200_vm3, %v2210_v5, %v2212_v27  ;;  %v1333_v30 = vrot.slane %v1331_v63, 3  ;;  %v1336_v59 = vrot.slane %v1334_v3, 4  ;;  %v2216_v14 = vrot.slane %v6381_v2, 1 }
 0x14b   : > { %4909 = vmatprep.subr.bf16.mxu1 %v5784_v31  ;;  %v6404_v41 = vsel %vm1249_vm2, %v1292_v37, %v1301_v47  ;;  %v6410_v51 = vsel %vm1249_vm2, %v1301_v47, %v1310_v50  ;;  %v6419_v49 = vsel %vm1249_vm2, %v1310_v50, %v1319_v55  ;;  %v1328_v60 = vor.u32 %v1327_v57, %v1324_v8 }
 0x14c   : > { %v6422_v9 = vsel %vm2200_vm3, %v2212_v27, %v2214_v58  ;;  %v1968_v36 = vshrl.u32 %v6252_v53, 16  ;;  %v1974_v37 = vrot.slane %v1972_v44, 1  ;;  %v1337_v63 = vor.u32 %v1336_v59, %v1333_v30 }
 0x14d   : > { %4838 = vmatmul.mubr.bf16.gmra.mrb[16].mxu1 %v1967_v17  ;;  %v6431_v56 = vsel %vm1249_vm2, %v1319_v55, %v1328_v60  ;;  %v6434_v15 = vsel %vm2200_vm3, %v2214_v58, %v2216_v14  ;;  %v1980_v4 = vshll.u32 %v6369_v62, 16  ;;  %v2422_v17 = vshrl.u32 %v6297_v61, 16 }
 0x14e   : > { %4841 = vmatprep.mubr.msk.bf16.mxu1 %vm5785_vm0, %v5784_v31  ;;  %v1970_v3 = vor.u32 %v1968_v36, %v6334_v21  ;;  %v6439_v23 = vsel %vm1249_vm2, %v1328_v60, %v1337_v63  ;;  %v2425_v33 = vshll.u32 %v6297_v61, 16  ;;  %v4105_v47 = vcombine.low %v6290_v11, %v6304_v19 }
 0x14f   : > { %4690 = vmatmul.mubr.bf16.gmra.mrb[48].mxu0 %v4104_v26  ;;  %v2218_v26 = vrot.slane %v6393_v46, 1  ;;  %v1976_v48 = vshrl.u32 %v6302_v18, 16  ;;  %v2424_v21 = vrot.slane %v2422_v17, 1  ;;  %v2433_v50 = vrot.slane %v1944_v10, 1 }
 0x150   : > { %4693 = vmatprep.mubr.msk.bf16.mxu0 %vm5785_vm0, %v5784_v31  ;;  %v1975_v5 = vsel %vm1584_vm1, %v1970_v3, %v1974_v37  ;;  %v2427_v38 = vrot.slane %v2425_v33, 2  ;;  %v2434_v27 = vrot.slane %v1940_v34, 2  ;;  %v1982_v8 = vrot.slane %v1980_v4, 1  ;;  %v5651_v3 = vld [vmem:[#allocation2 + $0x54] ss:$0 sps:$4 sm:$0x33]  }
 0x151   : > { %v6443_v29 = vsel %vm2200_vm3, %v2216_v14, %v2218_v26  ;;  %v1978_v61 = vor.u32 %v1976_v48, %v1974_v37  ;;  %v2437_v19 = vrot.slane %v1952_v12, 1  ;;  %v2438_v10 = vrot.slane %v1948_v20, 2 }
 0x152   : > { %v2428_v55 = vor.u32 %v2427_v38, %v2424_v21  ;;  %v2435_v11 = vor.u32 %v2434_v27, %v2433_v50  ;;  %v2441_v58 = vrot.slane %v1960_v45, 1  ;;  %v2442_v30 = vrot.slane %v1956_v6, 2 }
 0x153   : > { %v2439_v57 = vor.u32 %v2438_v10, %v2437_v19  ;;  %v1983_v12 = vsel %vm1584_vm1, %v1978_v61, %v1982_v8  ;;  %v1984_v54 = vshrl.u32 %v6369_v62, 16  ;;  %v1988_v20 = vshll.u32 %v6381_v2, 16  ;;  %v5612_v61 = vld [vmem:[%s7387_s3 + $0x88] sm:$0xff]   ;;  %v5613_v19 = vld [vmem:[%s7387_s3 + $0x90] sm:$0xff]  }
 0x154   : > { %v6465_v28 = vsel %vm2420_vm4, %v2428_v55, %v6346_v42  ;;  %v6469_v34 = vsel %vm2420_vm4, %v6346_v42, %v2435_v11  ;;  %v2443_v60 = vor.u32 %v2442_v30, %v2441_v58  ;;  %v2445_v14 = vrot.slane %v1968_v36, 1  ;;  %v5607_v58 = vld [vmem:[%s7387_s3 + $0x140] sm:$0xff]  }
 0x155   : > { %4842 = vmatmul.mubr.bf16.gmra.mrb[20].mxu1 %v1975_v5  ;;  %v6479_v59 = vsel %vm2420_vm4, %v2435_v11, %v2439_v57  ;;  %v4106_v42 = vcombine.low %v6311_v43, %v6337_v39  ;;  %v2446_v45 = vrot.slane %v1964_v1, 2  ;;  %v2449_v6 = vrot.slane %v1976_v48, 1  ;;  %v5616_v30 = vld [vmem:[%s7387_s3 + $0xa0] sm:$0xff]  }
 0x156   : > { %4845 = vmatprep.mubr.msk.bf16.mxu1 %vm5785_vm0, %v5784_v31  ;;  %v6488_v0 = vsel %vm2420_vm4, %v2439_v57, %v2443_v60  ;;  %v1992_v62 = vshrl.u32 %v6381_v2, 16  ;;  %v2450_v36 = vrot.slane %v1972_v44, 2  ;;  %v1990_v63 = vrot.slane %v1988_v20, 1  ;;  %v5611_v44 = vld [vmem:[%s7387_s3 + $0x80] sm:$0xff]   ;;  %v5615_v57 = vld [vmem:[%s7387_s3 + $0x98] sm:$0xff]  }
 0x157   : > { %4694 = vmatmul.mubr.bf16.gmra.mrb[52].mxu0 %v4105_v47  ;;  %v2447_v37 = vor.u32 %v2446_v45, %v2445_v14  ;;  %v2453_v53 = vrot.slane %v1984_v54, 1  ;;  %v2454_v39 = vrot.slane %v1980_v4, 2  ;;  %v1986_v26 = vor.u32 %v1984_v54, %v1982_v8  ;;  %v5618_v54 = vld [vmem:[%s7387_s3 + $0xa8] sm:$0xff]  }
 0x158   : > { %4697 = vmatprep.mubr.msk.bf16.mxu0 %vm5785_vm0, %v5784_v31  ;;  %v2451_v43 = vor.u32 %v2450_v36, %v2449_v6  ;;  %v2457_v33 = vrot.slane %v1992_v62, 1  ;;  %v2458_v5 = vrot.slane %v1988_v20, 2  ;;  %v1996_v4 = vshll.u32 %v6393_v46, 16  ;;  %v6558_v20 = vld [vmem:[#allocation2 + $0x44] sm:$0xff]   ;;  %v6564_v14 = vld [vmem:[#allocation2 + $0x1c] sm:$0xff]   ;;  %v6571_v6 = vld [vmem:[#allocation2 + $0x2c] sm:$0xff]  }
 0x159   : > { %v6496_v1 = vsel %vm2420_vm4, %v2443_v60, %v2447_v37  ;;  %v2455_v2 = vor.u32 %v2454_v39, %v2453_v53  ;;  %v1991_v18 = vsel %vm1584_vm1, %v1986_v26, %v1990_v63  ;;  %v2462_v21 = vshrl.u32 %v5651_v3, 16  ;;  %v6560_v60 = vld [vmem:[#allocation2 + $0x4c] sm:$0xff]   ;;  %v6569_v45 = vld [vmem:[#allocation2 + $0x24] sm:$0xff]   ;;  %v6587_v39 = vld [vmem:[#allocation2 + $0x5c] ss:$0 sps:$4 sm:$0x33]  }
 0x15a   : > { %v6499_v17 = vsel %vm2420_vm4, %v2447_v37, %v2451_v43  ;;  %v2459_v48 = vor.u32 %v2458_v5, %v2457_v33  ;;  %v2465_v50 = vshll.u32 %v5651_v3, 16  ;;  %v1994_v27 = vor.u32 %v1992_v62, %v1990_v63  ;;  %v6576_v62 = vld [vmem:[#allocation2 + $0x3c] sm:$0xff]   ;;  %v6578_v37 = vld [vmem:[#allocation2 + $0x54] sm:$0xff]   ;;  %v5609_v36 = vld [vmem:[%s7387_s3 + $0x150] sm:$0xff]  }
 0x15b   : > { %v6506_v47 = vsel %vm2420_vm4, %v2451_v43, %v2455_v2  ;;  %v2464_v8 = vrot.slane %v2462_v21, 1  ;;  %v1998_v55 = vrot.slane %v1996_v4, 1  ;;  %v2787_v63 = vshrl.u32 %v6558_v20, 16  ;;  %v5619_v26 = vld [vmem:[%s7387_s3 + $0xb0] sm:$0xff]   ;;  %v5610_v21 = vld [vmem:[%s7387_s3 + $0x158] sm:$0xff]  }
 0x15c   : > { %v6513_v38 = vsel %vm2420_vm4, %v2455_v2, %v2459_v48  ;;  %v2467_v46 = vrot.slane %v2465_v50, 2  ;;  %v2790_v53 = vshll.u32 %v6558_v20, 16  ;;  %v2796_v43 = vshrl.u32 %v6560_v60, 16 }
 0x15d   : > { %4846 = vmatmul.mubr.bf16.gmra.mrb[24].mxu1 %v1983_v12  ;;  %v5608_v12 = vld [vmem:[%s7387_s3 + $0x148] sm:$0xff]   ;;  %v3024_v2 = vrot.slane %v6564_v14, 2  ;;  %v3026_v33 = vrot.slane %v6569_v45, 2  ;;  %v3028_v5 = vrot.slane %v6571_v6, 2  ;;  %v3032_v4 = vrot.slane %v6576_v62, 2 }
 0x15e   : > { %4849 = vmatprep.mubr.msk.bf16.mxu1 %vm5785_vm0, %v5784_v31  ;;  %v2468_v11 = vor.u32 %v2467_v46, %v2464_v8  ;;  %v3271_v8 = vrot.slane %v2787_v63, 2  ;;  %v3272_v46 = vrot.slane %v2790_v53, 3 }
 0x15f   : > { %4698 = vmatmul.mubr.bf16.gmra.mrb[56].mxu0 %v4106_v42 }
 0x160   : > { %4717 = vmatprep.mubr.msk.bf16.mxu0 %vm5785_vm0, %v5784_v31  ;;  %v6527_v10 = vsel %vm2420_vm4, %v2459_v48, %v2468_v11  ;;  %v3036_v11 = vrot.slane %v6560_v60, 2 }
 0x165   : > { %4850 = vmatmul.mubr.bf16.gmra.mrb[28].mxu1 %v1991_v18  ;;  %v7396_v18 = vshll.u32 %v6560_v60, 16 }
 0x166   : > { %4853 = vmatprep.mubr.msk.bf16.mxu1 %vm5785_vm0, %v5784_v31 }
 0x167   : > { %4718 = vmatmul.mubr.bf16.vlgmr.msra.gmra.mrb[24].mxu0 %v6315_v25  ;;  %v1999_v25 = vsel %vm1584_vm1, %v1994_v27, %v1998_v55  ;;  %v6612_v27 = vsel %vm3022_vm5, %v3024_v2, %v3026_v33  ;;  %v6622_v55 = vsel %vm3022_vm5, %v3026_v33, %v3028_v5 }
 0x168   : > { %4721 = vmatprep.mubr.msk.bf16.mxu0 %vm5785_vm0, %v5784_v31  ;;  %4754 = vmatpush3.bf16.msra.mxu0 %v5611_v44  ;;  %v7395_v44 = vshrl.u32 %v6578_v37, 16 }
 0x169   : > { %4755 = vmatprep.subr.bf16.mxu0 %v5784_v31 }
 0x16c   : > { %4756 = vmatpush3.bf16.msra.mxu0 %v5612_v61  ;;  %v3034_v61 = vrot.slane %v6558_v20, 2 }
 0x16d   : > { %4854 = vmatmul.mubr.bf16.gmra.mrb[32].mxu1 %v1999_v25  ;;  %4757 = vmatprep.subr.bf16.mxu0 %v5784_v31  ;;  %v5686_v25 = vld [vmem:[#allocation2 + $0x5c] ss:$0 sps:$4 sm:$0x77]  }
 0x16e   : > { %4873 = vmatprep.mubr.msk.bf16.mxu1 %vm5785_vm0, %v5784_v31 }
 0x16f   : > { %4722 = vmatmul.mubr.bf16.gmra.mrb[28].mxu0 %v6367_v52  ;;  %v6546_v52 = vld [vmem:[#allocation2 + $0x18] sm:$0xf] }
 0x170   : > { %4725 = vmatprep.mubr.msk.bf16.mxu0 %vm5785_vm0, %v5784_v31  ;;  %4758 = vmatpush3.bf16.msra.mxu0 %v5613_v19 }
 0x171   : > { %4759 = vmatprep.subr.bf16.mxu0 %v5784_v31 }
 0x174   : > { %4760 = vmatpush3.bf16.msra.mxu0 %v5615_v57 }
 0x175   : > { %4874 = vmatmul.mubr.bf16.vlgmr.msra.gmra.mrb[0].mxu1 %v6357_v40  ;;  %4761 = vmatprep.subr.bf16.mxu0 %v5784_v31  ;;  %v3002_v40 = vld [vmem:[#allocation2 + $0x14] sm:$0xc] }
 0x176   : > { %4910 = vmatpush3.bf16.msra.mxu1 %v5607_v58  ;;  %4877 = vmatprep.mubr.msk.bf16.mxu1 %vm5785_vm0, %v5784_v31  ;;  %v6567_v42 = vcombine.low %v3002_v40, %v6546_v52  ;;  %v6637_v58 = vsel %vm3022_vm5, %v3032_v4, %v3034_v61  ;;  %v3275_v40 = vrot.slane %v2796_v43, 2 }
 0x177   : > { %4726 = vmatmul.mubr.bf16.gmra.mrb[32].mxu0 %v6379_v16  ;;  %4911 = vmatprep.subr.bf16.mxu1 %v5784_v31  ;;  %v6574_v16 = vld [vmem:[#allocation2 + $0x34] sm:$0xff]  }
 0x178   : > { %4729 = vmatprep.mubr.msk.bf16.mxu0 %vm5785_vm0, %v5784_v31  ;;  %4762 = vmatpush3.bf16.msra.mxu0 %v5616_v30  ;;  %v3023_v3 = vrot.slane %v6567_v42, 2  ;;  %v3030_v48 = vrot.slane %v6574_v16, 2  ;;  %v3038_v30 = vrot.slane %v6578_v37, 2 }
 0x179   : > { %4763 = vmatprep.subr.bf16.mxu0 %v5784_v31 }
 0x17a   : > { %4912 = vmatpush3.bf16.msra.mxu1 %v5608_v12  ;;  %v6609_v50 = vsel %vm3022_vm5, %v3023_v3, %v3024_v2  ;;  %v6631_v19 = vsel %vm3022_vm5, %v3028_v5, %v3030_v48  ;;  %v6634_v57 = vsel %vm3022_vm5, %v3030_v48, %v3032_v4  ;;  %v6642_v12 = vsel %vm3022_vm5, %v3034_v61, %v3036_v11 }
 0x17b   : > { %4913 = vmatprep.subr.bf16.mxu1 %v5784_v31  ;;  %v3276_v3 = vrot.slane %v7396_v18, 3  ;;  %v3279_v2 = vrot.slane %v7395_v44, 2  ;;  %v3284_v48 = vshrl.u32 %v5686_v25, 16  ;;  %v3287_v4 = vshll.u32 %v5686_v25, 16  ;;  %v5617_v25 = vld [vmem:[%s7387_s3 + $0x168] sm:$0xff]  }
 0x17c   : > { %4764 = vmatpush3.bf16.msra.mxu0 %v5618_v54  ;;  %v3040_v54 = vrot.slane %v6587_v39, 2 }
 0x17d   : > { %4878 = vmatmul.mubr.bf16.gmra.mrb[4].mxu1 %v6373_v13  ;;  %4765 = vmatprep.subr.bf16.mxu0 %v5784_v31  ;;  %v2808_v13 = vshll.u32 %v6578_v37, 16  ;;  %v3277_v61 = vor.u32 %v3276_v3, %v3275_v40  ;;  %v3286_v44 = vrot.slane %v3284_v48, 2  ;;  %v3289_v18 = vrot.slane %v3287_v4, 3  ;;  %v6722_v40 = vld [vmem:[%s7387_s3 + $0x200] sm:$0xff]   ;;  %v6734_v3 = vld [vmem:[%s7387_s3 + $0x208] sm:$0xff]   ;;  %v6741_v48 = vld [vmem:[%s7387_s3 + $0x210] sm:$0xff]  }
 0x17e   : > { %4881 = vmatprep.mubr.msk.bf16.mxu1 %vm5785_vm0, %v5784_v31  ;;  %4914 = vmatpush3.bf16.msra.mxu1 %v5609_v36  ;;  %v5614_v36 = vld [vmem:[%s7387_s3 + $0x160] sm:$0xff]   ;;  %v6661_v5 = vsel %vm3022_vm5, %v3038_v30, %v3040_v54 }
 0x17f   : > { %4730 = vmatmul.mubr.bf16.gmra.mrb[36].mxu0 %v6390_v32  ;;  %4915 = vmatprep.subr.bf16.mxu1 %v5784_v31  ;;  %v5621_v32 = vld [vmem:[%s7387_s3 + $0xb8] sm:$0xff]   ;;  %v3280_v33 = vrot.slane %v2808_v13, 3 }
 0x180   : > { %4733 = vmatprep.mubr.msk.bf16.mxu0 %vm5785_vm0, %v5784_v31  ;;  %4766 = vmatpush3.bf16.msra.mxu0 %v5619_v26  ;;  %v6651_v26 = vsel %vm3022_vm5, %v3036_v11, %v3038_v30  ;;  %v5620_v30 = vld [vmem:[%s7387_s3 + $0x170] sm:$0xff]  }
 0x181   : > { %4767 = vmatprep.subr.bf16.mxu0 %v5784_v31  ;;  %v3281_v11 = vor.u32 %v3280_v33, %v3279_v2  ;;  %v5627_v33 = vld [vmem:[#allocation2 + $0x1c] sm:$0xff]  }
 0x182   : > { %4916 = vmatpush3.bf16.msra.mxu1 %v5610_v21  ;;  %v6663_v21 = vor.u32 %v3272_v46, %v3271_v8 }
 0x183   : > { %4917 = vmatprep.subr.bf16.mxu1 %v5784_v31  ;;  %v6677_v46 = vsel %vm3242_vm6, %v3277_v61, %v3281_v11 }
 0x184   : > { %4768 = vmatpush3.bf16.msra.mxu0 %v5621_v32  ;;  %v6674_v8 = vsel %vm3242_vm6, %v6663_v21, %v3277_v61  ;;  %v1609_v61 = vshll.u32 %v5627_v33, 16 }
 0x185   : > { %4882 = vmatmul.mubr.bf16.gmra.mrb[8].mxu1 %v6384_v22  ;;  %5065 = vmatprep.subr.bf16.mxu0 %v5784_v31  ;;  %v3290_v22 = vor.u32 %v3289_v18, %v3286_v44  ;;  %v5625_v44 = vld [vmem:[#allocation2 + $0x14] sm:$0xff]  }
 0x186   : > { %4885 = vmatprep.mubr.msk.bf16.mxu1 %vm5785_vm0, %v5784_v31  ;;  %4918 = vmatpush3.bf16.msra.mxu1 %v5614_v36 }
 0x187   : > { %4734 = vmatmul.mubr.bf16.gmra.mrb[40].mxu0 %v6404_v41  ;;  %4919 = vmatprep.subr.bf16.mxu1 %v5784_v31  ;;  %v6684_v32 = vsel %vm3242_vm6, %v3281_v11, %v3290_v22  ;;  %v5624_v41 = vld [vmem:[%s7387_s3 + $0x178] sm:$0xff]   ;;  %v1611_v22 = vrot.slane %v1609_v61, 1  ;;  %v5637_v61 = vld [vmem:[%s7387_s3 + $0x1a0] sm:$0xff]  }
 0x188   : > { %4737 = vmatprep.mubr.msk.bf16.mxu0 %vm5785_vm0, %v5784_v31  ;;  %v6754_v11 = vld [vmem:[%s7387_s3 + $0x218] sm:$0xff]  }
 0x18a   : > { %4920 = vmatpush3.bf16.msra.mxu1 %v5617_v25  ;;  %v1605_v25 = vshrl.u32 %v5625_v44, 16 }
 0x18b   : > { %4921 = vmatprep.subr.bf16.mxu1 %v5784_v31 }
 0x18d   : > { %4886 = vmatmul.mubr.bf16.gmra.mrb[12].mxu1 %v6397_v7  ;;  %v5622_v7 = vld [vmem:[#allocation2 + $0x4] sm:$0xff]  }
 0x18e   : > { %4889 = vmatprep.mubr.msk.bf16.mxu1 %vm5785_vm0, %v5784_v31  ;;  %4922 = vmatpush3.bf16.msra.mxu1 %v5620_v30  ;;  %v1586_v18 = vshrl.u32 %v5622_v7, 16  ;;  %v5629_v30 = vld [vmem:[#allocation2 + $0x24] sm:$0xff]  }
 0x18f   : > { %4738 = vmatmul.mubr.bf16.gmra.mrb[44].mxu0 %v6410_v51  ;;  %4923 = vmatprep.subr.bf16.mxu1 %v5784_v31  ;;  %v1588_v51 = vshll.u32 %v5622_v7, 16  ;;  %v6764_v7 = vld [vmem:[%s7387_s3 + $0x220] sm:$0xff]  }
 0x190   : > { %4741 = vmatprep.mubr.msk.bf16.mxu0 %vm5785_vm0, %v5784_v31 }
 0x192   : > { %4924 = vmatpush3.bf16.msra.mxu1 %v5624_v41 }
 0x193   : > { %4961 = vmatprep.subr.bf16.mxu1 %v5784_v31 }
 0x195   : > { %4890 = vmatmul.mubr.bf16.gmra.mrb[16].mxu1 %v6400_v35  ;;  %v5623_v35 = vld [vmem:[#allocation2 + $0xc] sm:$0xff]  }
 0x196   : > { %4893 = vmatprep.mubr.msk.bf16.mxu1 %vm5785_vm0, %v5784_v31  ;;  %v1597_v36 = vshrl.u32 %v5623_v35, 16 }
 0x197   : > { %4742 = vmatmul.mubr.bf16.gmra.mrb[48].mxu0 %v6419_v49  ;;  %v1593_v49 = vshll.u32 %v5623_v35, 16 }
 0x198   : > { %4745 = vmatprep.mubr.msk.bf16.mxu0 %vm5785_vm0, %v5784_v31 }
 0x19d   : > { %4894 = vmatmul.mubr.bf16.gmra.mrb[20].mxu1 %v6413_v24  ;;  %v1590_v24 = vrot.slane %v1588_v51, 1  ;;  %v5628_v51 = vld [vmem:[%s7387_s3 + $0x188] sm:$0xff]  }
 0x19e   : > { %4897 = vmatprep.mubr.msk.bf16.mxu1 %vm5785_vm0, %v5784_v31 }
 0x19f   : > { %4746 = vmatmul.mubr.bf16.gmra.mrb[52].mxu0 %v6431_v56  ;;  %v1595_v56 = vrot.slane %v1593_v49, 1  ;;  %v1591_v54 = vor.u32 %v1590_v24, %v1586_v18  ;;  %v1617_v49 = vshll.u32 %v5629_v30, 16  ;;  %v6781_v24 = vld [vmem:[%s7387_s3 + $0x228] sm:$0xff]  }
 0x1a0   : > { %4749 = vmatprep.mubr.msk.bf16.mxu0 %vm5785_vm0, %v5784_v31 }
 0x1a5   : > { %4898 = vmatmul.mubr.bf16.gmra.mrb[24].mxu1 %v6422_v9  ;;  %v1596_v9 = vsel %vm1584_vm1, %v1591_v54, %v1595_v56  ;;  %v5631_v54 = vld [vmem:[#allocation2 + $0x2c] sm:$0xff]  }
 0x1a6   : > { %4901 = vmatprep.mubr.msk.bf16.mxu1 %vm5785_vm0, %v5784_v31 }
 0x1a7   : > { %4750 = vmatmul.mubr.bf16.gmra.mrb[56].mxu0 %v6439_v23  ;;  %v1601_v23 = vshll.u32 %v5625_v44, 16  ;;  %v5630_v44 = vld [vmem:[%s7387_s3 + $0x190] sm:$0xff]  }
 0x1a8   : > { %4769 = vmatprep.mubr.msk.bf16.mxu0 %vm5785_vm0, %v5784_v31 }
 0x1a9   : > { %v1603_v2 = vrot.slane %v1601_v23, 1 }
 0x1ab   : > { %v1607_v41 = vor.u32 %v1605_v25, %v1603_v2 }
 0x1ad   : > { %4902 = vmatmul.mubr.bf16.gmra.mrb[28].mxu1 %v6434_v15  ;;  %v1599_v15 = vor.u32 %v1597_v36, %v1595_v56  ;;  %v1612_v35 = vsel %vm1584_vm1, %v1607_v41, %v1611_v22  ;;  %v1619_v56 = vrot.slane %v1617_v49, 1  ;;  %v1625_v36 = vshll.u32 %v5631_v54, 16  ;;  %v5636_v41 = vld [vmem:[#allocation2 + $0x3c] sm:$0xff]   ;;  %v5646_v49 = vld [vmem:[%s7387_s3 + $0x1b0] sm:$0xff]  }
 0x1ae   : > { %4905 = vmatprep.mubr.msk.bf16.mxu1 %vm5785_vm0, %v5784_v31 }
 0x1af   : > { %4770 = vmatmul.mubr.bf16.vlgmr.msra.gmra.mrb[24].mxu0 %v1596_v9  ;;  %v1604_v4 = vsel %vm1584_vm1, %v1599_v15, %v1603_v2  ;;  %v6792_v9 = vld [vmem:[%s7387_s3 + $0x230] sm:$0xff]   ;;  %v5633_v15 = vld [vmem:[%s7387_s3 + $0x198] sm:$0xff]   ;;  %v1621_v2 = vshrl.u32 %v5629_v30, 16  ;;  %v5642_v30 = vld [vmem:[%s7387_s3 + $0x1a8] sm:$0xff]  }
 0x1b0   : > { %4773 = vmatprep.mubr.msk.bf16.mxu0 %vm5785_vm0, %v5784_v31  ;;  %5066 = vmatpush3.bf16.msra.mxu0 %v6722_v40 }
 0x1b1   : > { %5067 = vmatprep.subr.bf16.mxu0 %v5784_v31 }
 0x1b4   : > { %5068 = vmatpush3.bf16.msra.mxu0 %v6734_v3 }
 0x1b5   : > { %4906 = vmatmul.mubr.bf16.gmra.mrb[32].mxu1 %v6443_v29  ;;  %5069 = vmatprep.subr.bf16.mxu0 %v5784_v31  ;;  %v5626_v29 = vld [vmem:[%s7387_s3 + $0x180] sm:$0xff]  }
 0x1b6   : > { %4925 = vmatprep.mubr.msk.bf16.mxu1 %vm5785_vm0, %v5784_v31 }
 0x1b7   : > { %4774 = vmatmul.mubr.bf16.gmra.mrb[28].mxu0 %v1604_v4  ;;  %v5632_v4 = vld [vmem:[#allocation2 + $0x34] sm:$0xff]  }
 0x1b8   : > { %4777 = vmatprep.mubr.msk.bf16.mxu0 %vm5785_vm0, %v5784_v31  ;;  %5070 = vmatpush3.bf16.msra.mxu0 %v6741_v48 }
 0x1b9   : > { %5071 = vmatprep.subr.bf16.mxu0 %v5784_v31 }
 0x1bc   : > { %5072 = vmatpush3.bf16.msra.mxu0 %v6754_v11 }
 0x1bd   : > { %4926 = vmatmul.mubr.bf16.vlgmr.msra.gmra.mrb[0].mxu1 %v6465_v28  ;;  %5073 = vmatprep.subr.bf16.mxu0 %v5784_v31  ;;  %v1613_v28 = vshrl.u32 %v5627_v33, 16  ;;  %v1627_v33 = vrot.slane %v1625_v36, 1 }
 0x1be   : > { %4962 = vmatpush3.bf16.msra.mxu1 %v5626_v29  ;;  %4929 = vmatprep.mubr.msk.bf16.mxu1 %vm5785_vm0, %v5784_v31  ;;  %v1623_v29 = vor.u32 %v1621_v2, %v1619_v56  ;;  %v1645_v2 = vshrl.u32 %v5636_v41, 16 }
 0x1bf   : > { %4778 = vmatmul.mubr.bf16.gmra.mrb[32].mxu0 %v1612_v35  ;;  %4963 = vmatprep.subr.bf16.mxu1 %v5784_v31  ;;  %v1615_v18 = vor.u32 %v1613_v28, %v1611_v22  ;;  %v1633_v22 = vshll.u32 %v5632_v4, 16  ;;  %v1641_v28 = vshll.u32 %v5636_v41, 16 }
 0x1c0   : > { %4781 = vmatprep.mubr.msk.bf16.mxu0 %vm5785_vm0, %v5784_v31  ;;  %5074 = vmatpush3.bf16.msra.mxu0 %v6764_v7  ;;  %v1628_v25 = vsel %vm1584_vm1, %v1623_v29, %v1627_v33 }
 0x1c1   : > { %5075 = vmatprep.subr.bf16.mxu0 %v5784_v31  ;;  %v1620_v23 = vsel %vm1584_vm1, %v1615_v18, %v1619_v56  ;;  %v5650_v56 = vld [vmem:[%s7387_s3 + $0x1b8] sm:$0xff]  }
 0x1c2   : > { %4964 = vmatpush3.bf16.msra.mxu1 %v5628_v51  ;;  %v1635_v51 = vrot.slane %v1633_v22, 1 }
 0x1c3   : > { %4965 = vmatprep.subr.bf16.mxu1 %v5784_v31 }
 0x1c4   : > { %5076 = vmatpush3.bf16.msra.mxu0 %v6781_v24 }
 0x1c5   : > { %4930 = vmatmul.mubr.bf16.gmra.mrb[4].mxu1 %v6469_v34  ;;  %5077 = vmatprep.subr.bf16.mxu0 %v5784_v31  ;;  %v6809_v34 = vld [vmem:[%s7387_s3 + $0x238] sm:$0xff]  }
 0x1c6   : > { %4933 = vmatprep.mubr.msk.bf16.mxu1 %vm5785_vm0, %v5784_v31  ;;  %4966 = vmatpush3.bf16.msra.mxu1 %v5630_v44  ;;  %v1643_v44 = vrot.slane %v1641_v28, 1 }
 0x1c7   : > { %4782 = vmatmul.mubr.bf16.gmra.mrb[36].mxu0 %v1620_v23  ;;  %4967 = vmatprep.subr.bf16.mxu1 %v5784_v31 }
 0x1c8   : > { %4785 = vmatprep.mubr.msk.bf16.mxu0 %vm5785_vm0, %v5784_v31  ;;  %5078 = vmatpush3.bf16.msra.mxu0 %v6792_v9 }
 0x1c9   : > { %5079 = vmatprep.subr.bf16.mxu0 %v5784_v31 }
 0x1ca   : > { %4968 = vmatpush3.bf16.msra.mxu1 %v5633_v15 }
 0x1cb   : > { %4969 = vmatprep.subr.bf16.mxu1 %v5784_v31 }
 0x1cc   : > { %5080 = vmatpush3.bf16.msra.mxu0 %v6809_v34 }
 0x1cd   : > { %4934 = vmatmul.mubr.bf16.gmra.mrb[8].mxu1 %v6479_v59  ;;  %5117 = vmatprep.subr.bf16.mxu0 %v5784_v31  ;;  %v1629_v59 = vshrl.u32 %v5631_v54, 16  ;;  %v5640_v54 = vld [vmem:[#allocation2 + $0x44] sm:$0xff]  }
 0x1ce   : > { %4937 = vmatprep.mubr.msk.bf16.mxu1 %vm5785_vm0, %v5784_v31  ;;  %4970 = vmatpush3.bf16.msra.mxu1 %v5637_v61  ;;  %v1649_v15 = vshll.u32 %v5640_v54, 16  ;;  %v5644_v61 = vld [vmem:[#allocation2 + $0x4c] ss:$0 sps:$4 sm:$0x11]  }
 0x1cf   : > { %4786 = vmatmul.mubr.bf16.gmra.mrb[40].mxu0 %v1628_v25  ;;  %4971 = vmatprep.subr.bf16.mxu1 %v5784_v31  ;;  %v1631_v35 = vor.u32 %v1629_v59, %v1627_v33  ;;  %v1647_v33 = vor.u32 %v1645_v2, %v1643_v44  ;;  %v1657_v25 = vshll.u32 %v5644_v61, 16  ;;  %v2745_v59 = vshll.u32 %v6564_v14, 16 }
 0x1d0   : > { %4789 = vmatprep.mubr.msk.bf16.mxu0 %vm5785_vm0, %v5784_v31  ;;  %v2763_v61 = vshll.u32 %v6571_v6, 16 }
 0x1d1   : > { %v1636_v18 = vsel %vm1584_vm1, %v1631_v35, %v1635_v51  ;;  %v1659_v41 = vrot.slane %v1657_v25, 1  ;;  %v3244_v35 = vshrl.u32 %v6567_v42, 16  ;;  %v3252_v28 = vrot.slane %v2745_v59, 3  ;;  %v5667_v25 = vld [vmem:[%s7388_s4 + $0x10] sm:$0xff]  }
 0x1d2   : > { %4972 = vmatpush3.bf16.msra.mxu1 %v5642_v30  ;;  %v2742_v30 = vshrl.u32 %v6564_v14, 16 }
 0x1d3   : > { %4973 = vmatprep.subr.bf16.mxu1 %v5784_v31 }
 0x1d5   : > { %4938 = vmatmul.mubr.bf16.gmra.mrb[12].mxu1 %v6488_v0  ;;  %v1637_v0 = vshrl.u32 %v5632_v4, 16  ;;  %v1651_v4 = vrot.slane %v1649_v15, 1 }
 0x1d6   : > { %4941 = vmatprep.mubr.msk.bf16.mxu1 %vm5785_vm0, %v5784_v31  ;;  %4974 = vmatpush3.bf16.msra.mxu1 %v5646_v49  ;;  %v3251_v49 = vrot.slane %v2742_v30, 2 }
 0x1d7   : > { %4790 = vmatmul.mubr.bf16.gmra.mrb[44].mxu0 %v1636_v18  ;;  %4975 = vmatprep.subr.bf16.mxu1 %v5784_v31  ;;  %v1639_v23 = vor.u32 %v1637_v0, %v1635_v51  ;;  %v1652_v29 = vsel %vm1584_vm1, %v1647_v33, %v1651_v4  ;;  %v3246_v18 = vrot.slane %v3244_v35, 2  ;;  %v2751_v0 = vshrl.u32 %v6569_v45, 16 }
 0x1d8   : > { %4793 = vmatprep.mubr.msk.bf16.mxu0 %vm5785_vm0, %v5784_v31 }
 0x1d9   : > { %v1644_v36 = vsel %vm1584_vm1, %v1639_v23, %v1643_v44  ;;  %v3255_v15 = vrot.slane %v2751_v0, 2 }
 0x1da   : > { %4976 = vmatpush3.bf16.msra.mxu1 %v5650_v56  ;;  %v3253_v56 = vor.u32 %v3252_v28, %v3251_v49  ;;  %v2769_v28 = vshrl.u32 %v6574_v16, 16 }
 0x1db   : > { %5013 = vmatprep.subr.bf16.mxu1 %v5784_v31 }
 0x1dd   : > { %4942 = vmatmul.mubr.bf16.gmra.mrb[16].mxu1 %v6496_v1  ;;  %v1653_v1 = vshrl.u32 %v5640_v54, 16  ;;  %v5664_v54 = vld [vmem:[%s7388_s4] sm:$0xff]  }
 0x1de   : > { %4945 = vmatprep.mubr.msk.bf16.mxu1 %vm5785_vm0, %v5784_v31 }
 0x1df   : > { %4794 = vmatmul.mubr.bf16.gmra.mrb[48].mxu0 %v1644_v36  ;;  %v1655_v22 = vor.u32 %v1653_v1, %v1651_v4  ;;  %v2760_v4 = vshrl.u32 %v6571_v6, 16  ;;  %v2747_v1 = vrot.slane %v2745_v59, 2  ;;  %v3260_v6 = vrot.slane %v2763_v61, 3 }
 0x1e0   : > { %4797 = vmatprep.mubr.msk.bf16.mxu0 %vm5785_vm0, %v5784_v31 }
 0x1e1   : > { %v1660_v51 = vsel %vm1584_vm1, %v1655_v22, %v1659_v41 }
 0x1e5   : > { %4946 = vmatmul.mubr.bf16.gmra.mrb[20].mxu1 %v6499_v17  ;;  %v3247_v17 = vshll.u32 %v6567_v42, 16  ;;  %v2754_v42 = vshll.u32 %v6569_v45, 16  ;;  %v5666_v45 = vld [vmem:[%s7388_s4 + $0x8] sm:$0xff]  }
 0x1e6   : > { %4949 = vmatprep.mubr.msk.bf16.mxu1 %vm5785_vm0, %v5784_v31 }
 0x1e7   : > { %4798 = vmatmul.mubr.bf16.gmra.mrb[52].mxu0 %v1652_v29  ;;  %v3249_v14 = vrot.slane %v3247_v17, 3  ;;  %v3256_v2 = vrot.slane %v2754_v42, 3  ;;  %v2744_v29 = vrot.slane %v2742_v30, 1  ;;  %v3259_v17 = vrot.slane %v2760_v4, 2 }
 0x1e8   : > { %4801 = vmatprep.mubr.msk.bf16.mxu0 %vm5785_vm0, %v5784_v31 }
 0x1e9   : > { %v3250_v44 = vor.u32 %v3249_v14, %v3246_v18  ;;  %v2748_v30 = vor.u32 %v2747_v1, %v2744_v29  ;;  %v3261_v49 = vor.u32 %v3260_v6, %v3259_v17  ;;  %v2772_v18 = vshll.u32 %v6574_v16, 16  ;;  %v5656_v16 = vld [vmem:[%s7387_s3 + $0x1c8] sm:$0xff]   ;;  %v5675_v1 = vld [vmem:[%s7388_s4 + $0x30] sm:$0xff]   ;;  %v5662_v17 = vld [vmem:[%s7387_s3 + $0x1e0] sm:$0xff]  }
 0x1ea   : > { %v2765_v29 = vrot.slane %v2763_v61, 2 }
 0x1eb   : > { %v3254_v36 = vsel %vm3242_vm6, %v3250_v44, %v3253_v56  ;;  %v2756_v44 = vrot.slane %v2754_v42, 2  ;;  %v3264_v42 = vrot.slane %v2772_v18, 3 }
 0x1ed   : > { %4950 = vmatmul.mubr.bf16.gmra.mrb[24].mxu1 %v6506_v47  ;;  %v2650_v47 = vld [vmem:[#allocation2 + $0x14] sm:$0xe] }
 0x1ee   : > { %4953 = vmatprep.mubr.msk.bf16.mxu1 %vm5785_vm0, %v5784_v31  ;;  %v4187_v23 = vcombine.low %v2650_v47, %v6546_v52  ;;  %v5671_v47 = vld [vmem:[%s7388_s4 + $0x20] sm:$0xff]  }
 0x1ef   : > { %4802 = vmatmul.mubr.bf16.gmra.mrb[56].mxu0 %v1660_v51  ;;  %v5654_v51 = vld [vmem:[%s7387_s3 + $0x1c0] sm:$0xff]  }
 0x1f0   : > { %5081 = vmatprep.mubr.msk.bf16.mxu0 %vm5785_vm0, %v5784_v31  ;;  %v2734_v33 = vshrl.u32 %v4187_v23, 16  ;;  %v2737_v52 = vshll.u32 %v4187_v23, 16 }
 0x1f2   : > { %v2736_v22 = vrot.slane %v2734_v33, 1  ;;  %v2739_v35 = vrot.slane %v2737_v52, 2  ;;  %v2781_v33 = vshll.u32 %v6576_v62, 16  ;;  %v2762_v52 = vrot.slane %v2760_v4, 1  ;;  %v5660_v4 = vld [vmem:[%s7387_s3 + $0x1d8] sm:$0xff]  }
 0x1f4   : > { %v2740_v59 = vor.u32 %v2739_v35, %v2736_v22  ;;  %v3268_v22 = vrot.slane %v2781_v33, 3  ;;  %v2766_v61 = vor.u32 %v2765_v29, %v2762_v52  ;;  %v2814_v29 = vshrl.u32 %v6587_v39, 16 }
 0x1f5   : > { %4954 = vmatmul.mubr.bf16.gmra.mrb[28].mxu1 %v6513_v38  ;;  %v3257_v38 = vor.u32 %v3256_v2, %v3255_v15  ;;  %v5658_v2 = vld [vmem:[%s7387_s3 + $0x1d0] sm:$0xff]  }
 0x1f6   : > { %4957 = vmatprep.mubr.msk.bf16.mxu1 %vm5785_vm0, %v5784_v31  ;;  %v2749_v14 = vsel %vm2420_vm4, %v2740_v59, %v2748_v30 }
 0x1f7   : > { %5082 = vmatmul.mubr.bf16.vlgmr.msra.gmra.mrb[60].mxu0 %v3254_v36  ;;  %v3258_v41 = vsel %vm3242_vm6, %v3253_v56, %v3257_v38  ;;  %v2753_v56 = vrot.slane %v2751_v0, 1  ;;  %v3263_v0 = vrot.slane %v2769_v28, 2  ;;  %v5674_v36 = vld [vmem:[%s7388_s4 + $0x28] sm:$0xff]  }
 0x1f8   : > { %5085 = vmatprep.mubr.msk.bf16.mxu0 %vm5785_vm0, %v5784_v31  ;;  %5118 = vmatpush3.bf16.msra.mxu0 %v5664_v54  ;;  %v3262_v54 = vsel %vm3242_vm6, %v3257_v38, %v3261_v49 }
 0x1f9   : > { %5119 = vmatprep.subr.bf16.mxu0 %v5784_v31  ;;  %v2757_v23 = vor.u32 %v2756_v44, %v2753_v56  ;;  %v3265_v15 = vor.u32 %v3264_v42, %v3263_v0  ;;  %v2783_v56 = vrot.slane %v2781_v33, 2  ;;  %v2789_v0 = vrot.slane %v2787_v63, 1 }
 0x1fa   : > { %v2792_v42 = vrot.slane %v2790_v53, 2  ;;  %v7402_v63 = vshll.u32 %v6560_v60, 16  ;;  %v2810_v60 = vrot.slane %v2808_v13, 2 }
 0x1fb   : > { %v2758_v38 = vsel %vm2420_vm4, %v2748_v30, %v2757_v23  ;;  %v2767_v6 = vsel %vm2420_vm4, %v2757_v23, %v2766_v61  ;;  %v2771_v30 = vrot.slane %v2769_v28, 1  ;;  %v5668_v28 = vld [vmem:[%s7387_s3 + $0x1f0] sm:$0xff]  }
 0x1fc   : > { %5120 = vmatpush3.bf16.msra.mxu0 %v5666_v45  ;;  %v2778_v45 = vshrl.u32 %v6576_v62, 16  ;;  %v2793_v23 = vor.u32 %v2792_v42, %v2789_v0  ;;  %v2801_v20 = vrot.slane %v7402_v63, 2 }
 0x1fd   : > { %4958 = vmatmul.mubr.bf16.gmra.mrb[32].mxu1 %v6527_v10  ;;  %5121 = vmatprep.subr.bf16.mxu0 %v5784_v31  ;;  %v5670_v10 = vld [vmem:[%s7388_s4 + $0x18] sm:$0xff]  }
 0x1fe   : > { %4977 = vmatprep.mubr.msk.bf16.mxu1 %vm5785_vm0, %v5784_v31  ;;  %v3267_v62 = vrot.slane %v2778_v45, 2 }
 0x1ff   : > { %5086 = vmatmul.mubr.bf16.gmra.mrb[64].mxu0 %v3258_v41  ;;  %v5676_v41 = vld [vmem:[%s7388_s4 + $0x38] sm:$0xff]  }
 0x200   : > { %5089 = vmatprep.mubr.msk.bf16.mxu0 %vm5785_vm0, %v5784_v31  ;;  %5122 = vmatpush3.bf16.msra.mxu0 %v5667_v25  ;;  %v3266_v25 = vsel %vm3242_vm6, %v3261_v49, %v3265_v15  ;;  %v3269_v35 = vor.u32 %v3268_v22, %v3267_v62 }
 0x201   : > { %5123 = vmatprep.subr.bf16.mxu0 %v5784_v31 }
 0x202   : > { %v3270_v59 = vsel %vm3242_vm6, %v3265_v15, %v3269_v35  ;;  %v3274_v44 = vsel %vm3242_vm6, %v3269_v35, %v6663_v21  ;;  %v5677_v21 = vld [vmem:[%s6848_s18] sm:$0xff]  }
 0x204   : > { %5124 = vmatpush3.bf16.msra.mxu0 %v5670_v10  ;;  %v2774_v10 = vrot.slane %v2772_v18, 2 }
 0x205   : > { %4978 = vmatmul.mubr.bf16.vlgmr.msra.gmra.mrb[0].mxu1 %v2749_v14  ;;  %5125 = vmatprep.subr.bf16.mxu0 %v5784_v31  ;;  %v2780_v14 = vrot.slane %v2778_v45, 1  ;;  %v5679_v45 = vld [vmem:[%s6848_s18 + $0x10] sm:$0xff]  }
 0x206   : > { %5014 = vmatpush3.bf16.msra.mxu1 %v5654_v51  ;;  %4981 = vmatprep.mubr.msk.bf16.mxu1 %vm5785_vm0, %v5784_v31  ;;  %v5663_v51 = vld [vmem:[%s7387_s3 + $0x1e8] sm:$0xff]   ;;  %v2775_v49 = vor.u32 %v2774_v10, %v2771_v30 }
 0x207   : > { %5090 = vmatmul.mubr.bf16.gmra.mrb[68].mxu0 %v3262_v54  ;;  %5015 = vmatprep.subr.bf16.mxu1 %v5784_v31  ;;  %v2784_v54 = vor.u32 %v2783_v56, %v2780_v14 }
 0x208   : > { %5093 = vmatprep.mubr.msk.bf16.mxu0 %vm5785_vm0, %v5784_v31  ;;  %5126 = vmatpush3.bf16.msra.mxu0 %v5671_v47  ;;  %v2776_v18 = vsel %vm2420_vm4, %v2766_v61, %v2775_v49  ;;  %v5672_v47 = vld [vmem:[%s7387_s3 + $0x1f8] sm:$0xff]  }
 0x209   : > { %5127 = vmatprep.subr.bf16.mxu0 %v5784_v31  ;;  %v2794_v15 = vsel %vm2420_vm4, %v2784_v54, %v2793_v23 }
 0x20a   : > { %5016 = vmatpush3.bf16.msra.mxu1 %v5656_v16  ;;  %v2785_v16 = vsel %vm2420_vm4, %v2775_v49, %v2784_v54 }
 0x20b   : > { %5017 = vmatprep.subr.bf16.mxu1 %v5784_v31 }
 0x20c   : > { %5128 = vmatpush3.bf16.msra.mxu0 %v5674_v36  ;;  %v5678_v36 = vld [vmem:[%s6848_s18 + $0x8] sm:$0xff]  }
 0x20d   : > { %4982 = vmatmul.mubr.bf16.gmra.mrb[4].mxu1 %v2758_v38  ;;  %5129 = vmatprep.subr.bf16.mxu0 %v5784_v31  ;;  %v7403_v38 = vshrl.u32 %v6578_v37, 16  ;;  %v2816_v37 = vrot.slane %v2814_v29, 1 }
 0x20e   : > { %4985 = vmatprep.mubr.msk.bf16.mxu1 %vm5785_vm0, %v5784_v31  ;;  %5018 = vmatpush3.bf16.msra.mxu1 %v5658_v2  ;;  %v2798_v2 = vrot.slane %v2796_v43, 1 }
 0x20f   : > { %5094 = vmatmul.mubr.bf16.gmra.mrb[72].mxu0 %v3266_v25  ;;  %5019 = vmatprep.subr.bf16.mxu1 %v5784_v31  ;;  %v2807_v52 = vrot.slane %v7403_v38, 1  ;;  %v5680_v25 = vld [vmem:[%s6848_s18 + $0x18] sm:$0xff]  }
 0x210   : > { %5097 = vmatprep.mubr.msk.bf16.mxu0 %vm5785_vm0, %v5784_v31  ;;  %5130 = vmatpush3.bf16.msra.mxu0 %v5675_v1  ;;  %v2802_v53 = vor.u32 %v2801_v20, %v2798_v2  ;;  %v2817_v1 = vshll.u32 %v6587_v39, 16  ;;  %v5682_v39 = vld [vmem:[%s6848_s18 + $0x28] sm:$0xff]  }
 0x211   : > { %5131 = vmatprep.subr.bf16.mxu0 %v5784_v31  ;;  %v2811_v43 = vor.u32 %v2810_v60, %v2807_v52 }
 0x212   : > { %5020 = vmatpush3.bf16.msra.mxu1 %v5660_v4  ;;  %v2803_v33 = vsel %vm2420_vm4, %v2793_v23, %v2802_v53  ;;  %v2819_v13 = vrot.slane %v2817_v1, 2  ;;  %v5681_v4 = vld [vmem:[%s6848_s18 + $0x20] sm:$0xff]  }
 0x213   : > { %5021 = vmatprep.subr.bf16.mxu1 %v5784_v31  ;;  %v2812_v62 = vsel %vm2420_vm4, %v2802_v53, %v2811_v43 }
 0x214   : > { %5132 = vmatpush3.bf16.msra.mxu0 %v5676_v41  ;;  %v2820_v22 = vor.u32 %v2819_v13, %v2816_v37  ;;  %v5683_v41 = vld [vmem:[%s6848_s18 + $0x30] sm:$0xff]  }
 0x215   : > { %4986 = vmatmul.mubr.bf16.gmra.mrb[8].mxu1 %v2767_v6 }
 0x216   : > { %4989 = vmatprep.mubr.msk.bf16.mxu1 %vm5785_vm0, %v5784_v31  ;;  %5022 = vmatpush3.bf16.msra.mxu1 %v5662_v17  ;;  %v2821_v61 = vsel %vm2420_vm4, %v2811_v43, %v2820_v22 }
 0x217   : > { %5098 = vmatmul.mubr.bf16.gmra.mrb[76].mxu0 %v3270_v59  ;;  %5023 = vmatprep.subr.bf16.mxu1 %v5784_v31 }
 0x218   : > { %5101 = vmatprep.mubr.msk.bf16.mxu0 %vm5785_vm0, %v5784_v31 }
 0x21a   : > { %5024 = vmatpush3.bf16.msra.mxu1 %v5663_v51 }
 0x21b   : > { %5025 = vmatprep.subr.bf16.mxu1 %v5784_v31 }
 0x21d   : > { %4990 = vmatmul.mubr.bf16.gmra.mrb[12].mxu1 %v2776_v18 }
 0x21e   : > { %4993 = vmatprep.mubr.msk.bf16.mxu1 %vm5785_vm0, %v5784_v31  ;;  %5026 = vmatpush3.bf16.msra.mxu1 %v5668_v28 }
 0x21f   : > { %5102 = vmatmul.mubr.bf16.gmra.mrb[80].mxu0 %v3274_v44  ;;  %5027 = vmatprep.subr.bf16.mxu1 %v5784_v31 }
 0x220   : > { %5133 = vmatprep.mubr.msk.bf16.mxu0 %vm5785_vm0, %v5784_v31 }
 0x222   : > { %5028 = vmatpush3.bf16.msra.mxu1 %v5672_v47 }
 0x223   : > { %5169 = vmatprep.subr.bf16.mxu1 %v5784_v31 }
 0x225   : > { %4994 = vmatmul.mubr.bf16.gmra.mrb[16].mxu1 %v2785_v16 }
 0x226   : > { %4997 = vmatprep.mubr.msk.bf16.mxu1 %vm5785_vm0, %v5784_v31 }
 0x227   : > { %5134 = vmatmul.mubr.bf16.vlgmr.msra.gmra.mrb[84].mxu0 %v5677_v21 }
 0x228   : > { %5137 = vmatprep.mubr.msk.bf16.mxu0 %vm5785_vm0, %v5784_v31 }
 0x22d   : > { %4998 = vmatmul.mubr.bf16.gmra.mrb[20].mxu1 %v2794_v15 }
 0x22e   : > { %5001 = vmatprep.mubr.msk.bf16.mxu1 %vm5785_vm0, %v5784_v31 }
 0x22f   : > { %5138 = vmatmul.mubr.bf16.gmra.mrb[88].mxu0 %v5678_v36 }
 0x230   : > { %5141 = vmatprep.mubr.msk.bf16.mxu0 %vm5785_vm0, %v5784_v31 }
 0x235   : > { %5002 = vmatmul.mubr.bf16.gmra.mrb[24].mxu1 %v2803_v33 }
 0x236   : > { %5005 = vmatprep.mubr.msk.bf16.mxu1 %vm5785_vm0, %v5784_v31 }
 0x237   : > { %5142 = vmatmul.mubr.bf16.gmra.mrb[92].mxu0 %v5679_v45 }
 0x238   : > { %5145 = vmatprep.mubr.msk.bf16.mxu0 %vm5785_vm0, %v5784_v31 }
 0x23d   : > { %5006 = vmatmul.mubr.bf16.gmra.mrb[28].mxu1 %v2812_v62 }
 0x23e   : > { %5009 = vmatprep.mubr.msk.bf16.mxu1 %vm5785_vm0, %v5784_v31 }
 0x23f   : > { %5146 = vmatmul.mubr.bf16.gmra.mrb[96].mxu0 %v5680_v25 }
 0x240   : > { %5149 = vmatprep.mubr.msk.bf16.mxu0 %vm5785_vm0, %v5784_v31 }
 0x245   : > { %5010 = vmatmul.mubr.bf16.gmra.mrb[32].mxu1 %v2821_v61 }
 0x246   : > { %5029 = vmatprep.mubr.msk.bf16.mxu1 %vm5785_vm0, %v5784_v31 }
 0x247   : > { %5150 = vmatmul.mubr.bf16.gmra.mrb[100].mxu0 %v5681_v4 }
 0x248   : > { %5153 = vmatprep.mubr.msk.bf16.mxu0 %vm5785_vm0, %v5784_v31 }
 0x24d   : > { %5030 = vmatmul.mubr.bf16.vlgmr.msra.gmra.mrb[0].mxu1 %v6609_v50  ;;  %v5684_v50 = vld [vmem:[%s6848_s18 + $0x38] sm:$0xff]  }
 0x24e   : > { %5177 = vmatpush3.bf16.msra.mxu1 %v6722_v40  ;;  %5033 = vmatprep.mubr.msk.bf16.mxu1 %vm5785_vm0, %v5784_v31 }
 0x24f   : > { %5170 = vmatprep.subr.bf16.mxu1 %v5784_v31  ;;  %5154 = vmatmul.mubr.bf16.gmra.mrb[104].mxu0 %v5682_v39 }
 0x250   : > { %5157 = vmatprep.mubr.msk.bf16.mxu0 %vm5785_vm0, %v5784_v31 }
 0x252   : > { %5178 = vmatpush3.bf16.msra.mxu1 %v6734_v3 }
 0x253   : > { %5171 = vmatprep.subr.bf16.mxu1 %v5784_v31 }
 0x255   : > { %5034 = vmatmul.mubr.bf16.gmra.mrb[4].mxu1 %v6612_v27  ;;  %v5685_v27 = vld [vmem:[%s6848_s18 + $0x40] sm:$0xff]   ;;  %s3947_s18 = sshll.u32 %s7210_s27, 4  ;;  %s7322_s18 = int_to_ptr.vmem [resolvable:$true] %s3947_s18 }
 0x256   : > { %5037 = vmatprep.mubr.msk.bf16.mxu1 %vm5785_vm0, %v5784_v31  ;;  %5179 = vmatpush3.bf16.msra.mxu1 %v6741_v48  ;;  %s5687_s20 = scalar_lea.vmem %s7322_s18, 1152  ;;  %p5694_p4 = scmp.lt.s32.totalorder %s7322_s18, %s5692_s22 }
 0x257   : > { %5172 = vmatprep.subr.bf16.mxu1 %v5784_v31  ;;  %5158 = vmatmul.mubr.bf16.gmra.mrb[108].mxu0 %v5683_v41  ;;  %p5688_p0 = scmp.ne.s32.totalorder %s7322_s18, %s5687_s20  ;;  %p5695_p5 = scmp.lt.s32.totalorder %s5693_s9, %s5687_s20 }
 0x258   : > { %5161 = vmatprep.mubr.msk.bf16.mxu0 %vm5785_vm0, %v5784_v31 }
 0x259   : > { %p5689_p1 = pnand %p5688_p0, %p5880_p3  ;;  %p5696_p6 = por %p5695_p5, %p5694_p4 }
 0x25a   : > { %5180 = vmatpush3.bf16.msra.mxu1 %v6754_v11 }
 0x25b   : > { %5173 = vmatprep.subr.bf16.mxu1 %v5784_v31  ;;  %p5690_p2 = pneg %p5689_p1 }
 0x25d   : > { %5038 = vmatmul.mubr.bf16.gmra.mrb[8].mxu1 %v6622_v55  ;;  %p5697_p7 = pnand %p5696_p6, %p5690_p2 }
 0x25e   : > { %5041 = vmatprep.mubr.msk.bf16.mxu1 %vm5785_vm0, %v5784_v31  ;;  %5181 = vmatpush3.bf16.msra.mxu1 %v6764_v7 }
 0x25f   : > { %5174 = vmatprep.subr.bf16.mxu1 %v5784_v31  ;;  %5162 = vmatmul.mubr.bf16.gmra.mrb[112].mxu0 %v5684_v50 }
 0x260   : > { %5165 = vmatprep.mubr.msk.bf16.mxu0 %vm5785_vm0, %v5784_v31 }
 0x262   : > { %5182 = vmatpush3.bf16.msra.mxu1 %v6781_v24 }
 0x263   : > { %5175 = vmatprep.subr.bf16.mxu1 %v5784_v31 }
 0x265   : > { %5042 = vmatmul.mubr.bf16.gmra.mrb[12].mxu1 %v6631_v19 }
 0x266   : > { %5045 = vmatprep.mubr.msk.bf16.mxu1 %vm5785_vm0, %v5784_v31  ;;  %5183 = vmatpush3.bf16.msra.mxu1 %v6792_v9 }
 0x267   : > { %5176 = vmatprep.subr.bf16.mxu1 %v5784_v31  ;;  %5166 = vmatmul.mubr.bf16.gmra.mrb[116].mxu0 %v5685_v27 }
 0x26a   : > { %5184 = vmatpush3.bf16.msra.mxu1 %v6809_v34 }
 0x26d   : > { %5046 = vmatmul.mubr.bf16.gmra.mrb[16].mxu1 %v6634_v57 }
 0x26e   : > { %5049 = vmatprep.mubr.msk.bf16.mxu1 %vm5785_vm0, %v5784_v31 }
 0x275   : > { %5050 = vmatmul.mubr.bf16.gmra.mrb[20].mxu1 %v6637_v58 }
 0x276   : > { %5053 = vmatprep.mubr.msk.bf16.mxu1 %vm5785_vm0, %v5784_v31 }
 0x27d   : > { %5054 = vmatmul.mubr.bf16.gmra.mrb[24].mxu1 %v6642_v12 }
 0x27e   : > { %5057 = vmatprep.mubr.msk.bf16.mxu1 %vm5785_vm0, %v5784_v31 }
 0x282   : > { %v7075_v55 = vpop.f32.mrb[24].mxu0 }
 0x283   : > { %v4771_v19 = vpop.f32.mrb[25].mxu0 }
 0x284   : > { %v7077_v40 = vpop.f32.mrb[26].mxu0 }
 0x285   : > { %5058 = vmatmul.mubr.bf16.gmra.mrb[28].mxu1 %v6651_v26  ;;  %v4772_v57 = vpop.f32.mrb[27].mxu0 }
 0x286   : > { %5061 = vmatprep.mubr.msk.bf16.mxu1 %vm5785_vm0, %v5784_v31 }
 0x28a   : > { %v7082_v58 = vpop.f32.mrb[28].mxu0 }
 0x28b   : > { %v4775_v3 = vpop.f32.mrb[29].mxu0 }
 0x28c   : > { %v7084_v48 = vpop.f32.mrb[30].mxu0 }
 0x28d   : > { %5062 = vmatmul.mubr.bf16.gmra.mrb[32].mxu1 %v6661_v5  ;;  %v4776_v12 = vpop.f32.mrb[31].mxu0 }
 0x28e   : > { %5105 = vmatprep.mubr.msk.bf16.mxu1 %vm5785_vm0, %v5784_v31 }
 0x292   : > { %v7089_v11 = vpop.f32.mrb[32].mxu0 }
 0x293   : > { %v4779_v7 = vpop.f32.mrb[33].mxu0 }
 0x294   : > { %v7091_v24 = vpop.f32.mrb[34].mxu0 }
 0x295   : > { %5106 = vmatmul.mubr.bf16.vlgmr.msra.gmra.mrb[24].mxu1 %v6674_v8  ;;  %v4780_v26 = vpop.f32.mrb[35].mxu0 }
 0x296   : > { %5109 = vmatprep.mubr.msk.bf16.mxu1 %vm5785_vm0, %v5784_v31 }
 0x29a   : > { %v7096_v9 = vpop.f32.mrb[36].mxu0 }
 0x29b   : > { %v4783_v34 = vpop.f32.mrb[37].mxu0 }
 0x29c   : > { %v7098_v35 = vpop.f32.mrb[38].mxu0 }
 0x29d   : > { %5110 = vmatmul.mubr.bf16.gmra.mrb[28].mxu1 %v6677_v46  ;;  %v4784_v5 = vpop.f32.mrb[39].mxu0 }
 0x29e   : > { %5113 = vmatprep.mubr.msk.bf16.mxu1 %vm5785_vm0, %v5784_v31 }
 0x2a2   : > { %v7103_v17 = vpop.f32.mrb[40].mxu0 }
 0x2a3   : > { %v4787_v6 = vpop.f32.mrb[41].mxu0 }
 0x2a4   : > { %v7105_v30 = vpop.f32.mrb[42].mxu0 }
 0x2a5   : > { %5114 = vmatmul.mubr.bf16.gmra.mrb[32].mxu1 %v6684_v32  ;;  %v4788_v8 = vpop.f32.mrb[43].mxu0 }
 0x2aa   : > { %v7108_v10 = vpop.f32.mrb[44].mxu0 }
 0x2ab   : > { %v4791_v59 = vpop.f32.mrb[45].mxu0 }
 0x2ac   : > { %v7110_v51 = vpop.f32.mrb[46].mxu0 }
 0x2ad   : > { %v4792_v49 = vpop.f32.mrb[47].mxu0 }
 0x2b2   : > { %v7112_v28 = vpop.f32.mrb[48].mxu0 }
 0x2b3   : > { %v4795_v46 = vpop.f32.mrb[49].mxu0 }
 0x2b4   : > { %v7114_v18 = vpop.f32.mrb[50].mxu0 }
 0x2b5   : > { %v4796_v31 = vpop.f32.mrb[51].mxu0 }
 0x2ba   : > { %v7116_v14 = vpop.f32.mrb[52].mxu0 }
 0x2bb   : > { %v4799_v56 = vpop.f32.mrb[53].mxu0 }
 0x2bc   : > { %v7118_v44 = vpop.f32.mrb[54].mxu0 }
 0x2bd   : > { %v4800_v47 = vpop.f32.mrb[55].mxu0 }
 0x2c2   : > { %v7120_v32 = vpop.f32.mrb[56].mxu0 }
 0x2c3   : > { %v4803_v54 = vpop.f32.mrb[57].mxu0 }
 0x2c4   : > { %v7122_v21 = vpop.f32.mrb[58].mxu0  ;;  %v7159_v54 = vld [vmem:[%s7390_s6 + $0x4] ss:$0 sm:$0xff] }
 0x2c5   : > { %v4804_v16 = vpop.f32.mrb[59].mxu0 }
 0x2ca   : > { %v3383_v0 = vpop.f32.mrb[60].mxu0 }
 0x2cb   : > { %v5083_v42 = vpop.f32.mrb[61].mxu0 }
 0x2cc   : > { %v3386_v23 = vpop.f32.mrb[62].mxu0 }
 0x2cd   : > { %v5084_v36 = vpop.f32.mrb[63].mxu0 }
 0x2d2   : > { %v7124_v15 = vpop.f32.mrb[64].mxu0 }
 0x2d3   : > { %v5087_v2 = vpop.f32.mrb[65].mxu0 }
 0x2d4   : > { %v7126_v63 = vpop.f32.mrb[66].mxu0 }
 0x2d5   : > { %v5088_v20 = vpop.f32.mrb[67].mxu0 }
 0x2d6   : > { %v7166_v20 = vld [vmem:[%s7390_s6 + $0x2] ss:$0 sm:$0xff] }
 0x2da   : > { %v7128_v53 = vpop.f32.mrb[68].mxu0 }
 0x2db   : > { %v5091_v45 = vpop.f32.mrb[69].mxu0 }
 0x2dc   : > { %v7130_v33 = vpop.f32.mrb[70].mxu0 }
 0x2dd   : > { %v5092_v38 = vpop.f32.mrb[71].mxu0 }
 0x2de   : > { %v7171_v38 = vld [vmem:[%s7390_s6 + $0x5] ss:$0 sm:$0xff] }
 0x2e2   : > { %v7132_v52 = vpop.f32.mrb[72].mxu0 }
 0x2e3   : > { %v5095_v60 = vpop.f32.mrb[73].mxu0 }
 0x2e4   : > { %v7134_v43 = vpop.f32.mrb[74].mxu0 }
 0x2e5   : > { %v5096_v29 = vpop.f32.mrb[75].mxu0 }
 0x2ea   : > { %v7136_v1 = vpop.f32.mrb[76].mxu0 }
 0x2eb   : > { %v5099_v25 = vpop.f32.mrb[77].mxu0 }
 0x2ec   : > { %v7138_v62 = vpop.f32.mrb[78].mxu0 }
 0x2ed   : > { %v5100_v37 = vpop.f32.mrb[79].mxu0 }
 0x2f2   : > { %v7140_v13 = vpop.f32.mrb[80].mxu0 }
 0x2f3   : > { %v5103_v22 = vpop.f32.mrb[81].mxu0 }
 0x2f4   : > { %v7142_v4 = vpop.f32.mrb[82].mxu0 }
 0x2f5   : > { %v5104_v61 = vpop.f32.mrb[83].mxu0 }
 0x2f6   : > { %v7180_v61 = vld [vmem:[%s7390_s6 + $0x3] ss:$0 sm:$0xff] }
 0x2fa   : > { %v3688_v39 = vpop.f32.mrb[84].mxu0 }
 0x2fb   : > { %v5135_v41 = vpop.f32.mrb[85].mxu0  ;;  %v3764_v2 = vmul.f32 %v7159_v54, %v3688_v39 }
 0x2fc   : > { %v3691_v50 = vpop.f32.mrb[86].mxu0 }
 0x2fd   : > { %v5136_v27 = vpop.f32.mrb[87].mxu0  ;;  %v3765_v37 = vmul.f32 %v7159_v54, %v3691_v50 }
 0x2ff   : > { %v3788_v50 = vadd.f32 %v7171_v38, %v3765_v37 }
 0x302   : > { %v3696_v19 = vpop.f32.mrb[88].mxu0 }
 0x303   : > { %v5139_v57 = vpop.f32.mrb[89].mxu0 }
 0x304   : > { %v3699_v3 = vpop.f32.mrb[90].mxu0  ;;  %v3787_v57 = vadd.f32 %v7171_v38, %v3764_v2 }
 0x305   : > { %v5140_v12 = vpop.f32.mrb[91].mxu0 }
 0x30a   : > { %v7144_v7 = vpop.f32.mrb[92].mxu0 }
 0x30b   : > { %v5143_v26 = vpop.f32.mrb[93].mxu0 }
 0x30c   : > { %v7146_v34 = vpop.f32.mrb[94].mxu0 }
 0x30d   : > { %v5144_v5 = vpop.f32.mrb[95].mxu0 }
 0x30e   : > { %v3766_v5 = vmul.f32 %v7159_v54, %v3696_v19 }
 0x312   : > { %v7148_v6 = vpop.f32.mrb[96].mxu0 }
 0x313   : > { %v5147_v8 = vpop.f32.mrb[97].mxu0 }
 0x314   : > { %v7150_v59 = vpop.f32.mrb[98].mxu0 }
 0x315   : > { %v5148_v49 = vpop.f32.mrb[99].mxu0 }
 0x31a   : > { %v7152_v46 = vpop.f32.mrb[100].mxu0 }
 0x31b   : > { %v5151_v31 = vpop.f32.mrb[101].mxu0 }
 0x31c   : > { %v7154_v56 = vpop.f32.mrb[102].mxu0 }
 0x31d   : > { %v5152_v47 = vpop.f32.mrb[103].mxu0 }
 0x320   : > { %v3133_v16 = vpop.f32.mrb[0].mxu1 }
 0x321   : > { %v5185_v42 = vadd.f32 %v3133_v16, %v7075_v55  ;;  %v5031_v36 = vpop.f32.mrb[1].mxu1 }
 0x322   : > { %v3136_v45 = vpop.f32.mrb[2].mxu1  ;;  %v7173_v60 = vpop.f32.mrb[104].mxu0 }
 0x323   : > { %v5186_v29 = vadd.f32 %v5185_v42, %v3383_v0  ;;  %v5187_v55 = vadd.f32 %v3136_v45, %v7077_v40  ;;  %v5032_v25 = vpop.f32.mrb[3].mxu1  ;;  %v5155_v22 = vpop.f32.mrb[105].mxu0 }
 0x324   : > { %v7182_v39 = vpop.f32.mrb[106].mxu0 }
 0x325   : > { %v3477_v41 = vmul.f32 %v5186_v29, %v7166_v20  ;;  %v5188_v27 = vadd.f32 %v5187_v55, %v3386_v23  ;;  %v5156_v0 = vpop.f32.mrb[107].mxu0  ;;  %v3767_v29 = vmul.f32 %v7159_v54, %v3699_v3  ;;  %v3789_v55 = vadd.f32 %v7171_v38, %v3766_v5 }
 0x327   : > { %v3478_v40 = vmul.f32 %v5188_v27, %v7166_v20  ;;  %v3500_v12 = vadd.f32 %v7180_v61, %v3477_v41  ;;  %v3790_v0 = vadd.f32 %v7171_v38, %v3767_v29 }
 0x328   : > { %v3141_v26 = vpop.f32.mrb[4].mxu1 }
 0x329   : > { %v3805_v8 = vadd.f32 %v3787_v57, %v3500_v12  ;;  %v3501_v49 = vadd.f32 %v7180_v61, %v3478_v40  ;;  %v5189_v31 = vadd.f32 %v3141_v26, %v7082_v58  ;;  %v5035_v47 = vpop.f32.mrb[5].mxu1  ;;  %v3768_v40 = vmul.f32 %v7159_v54, %v7144_v7 }
 0x32a   : > { %v3144_v23 = vpop.f32.mrb[6].mxu1  ;;  %v7195_v16 = vpop.f32.mrb[108].mxu0  ;;  %v3769_v7 = vmul.f32 %v7159_v54, %v7146_v34 }
 0x32b   : > { %v3806_v42 = vadd.f32 %v3788_v50, %v3501_v49  ;;  %v5190_v36 = vadd.f32 %v5189_v31, %v7124_v15  ;;  %v5191_v2 = vadd.f32 %v3144_v23, %v7084_v48  ;;  %v5036_v45 = vpop.f32.mrb[7].mxu1  ;;  %v5159_v19 = vpop.f32.mrb[109].mxu0  ;;  %v3823_v58 = vmax.f32 %v3805_v8, 0.0 }
 0x32c   : > { %v7201_v25 = vpop.f32.mrb[110].mxu0 }
 0x32d   : > { %v3824_v37 = vmax.f32 %v3806_v42, 0.0  ;;  %v3479_v22 = vmul.f32 %v5190_v36, %v7166_v20  ;;  %v5192_v41 = vadd.f32 %v5191_v2, %v7126_v63  ;;  %v5160_v27 = vpop.f32.mrb[111].mxu0  ;;  %v3791_v36 = vadd.f32 %v7171_v38, %v3768_v40 }
 0x32f   : > { %v4359_v57 = vpack.c.bf16 %v3824_v37, %v3823_v58  ;;  %v3480_v15 = vmul.f32 %v5192_v41, %v7166_v20  ;;  %v3502_v48 = vadd.f32 %v7180_v61, %v3479_v22  ;;  %v3792_v37 = vadd.f32 %v7171_v38, %v3769_v7 }
 0x330   : > { %v3149_v3 = vpop.f32.mrb[8].mxu1  ;;  %v3770_v22 = vmul.f32 %v7159_v54, %v7148_v6  ;;  %v3771_v6 = vmul.f32 %v7159_v54, %v7150_v59 }
 0x331   : > { %4360 = vst [vmem:[%s7210_s27] sm:$0xff] %v4359_v57   ;;  %v3807_v12 = vadd.f32 %v3789_v55, %v3502_v48  ;;  %v3503_v50 = vadd.f32 %v7180_v61, %v3480_v15  ;;  %v5193_v63 = vadd.f32 %v3149_v3, %v7089_v11  ;;  %v5039_v26 = vpop.f32.mrb[9].mxu1 }
 0x332   : > { %v3152_v5 = vpop.f32.mrb[10].mxu1  ;;  %v7215_v8 = vpop.f32.mrb[112].mxu0  ;;  %v3794_v7 = vadd.f32 %v7171_v38, %v3771_v6 }
 0x333   : > { %v3808_v49 = vadd.f32 %v3790_v0, %v3503_v50  ;;  %v5194_v31 = vadd.f32 %v5193_v63, %v7128_v53  ;;  %v5195_v47 = vadd.f32 %v3152_v5, %v7091_v24  ;;  %v5040_v23 = vpop.f32.mrb[11].mxu1  ;;  %v5163_v42 = vpop.f32.mrb[113].mxu0  ;;  %v3825_v11 = vmax.f32 %v3807_v12, 0.0 }
 0x334   : > { %v7222_v2 = vpop.f32.mrb[114].mxu0  ;;  %v3793_v63 = vadd.f32 %v7171_v38, %v3770_v22  ;;  %v3772_v42 = vmul.f32 %v7159_v54, %v7152_v46 }
 0x335   : > { %v3826_v45 = vmax.f32 %v3808_v49, 0.0  ;;  %v3481_v29 = vmul.f32 %v5194_v31, %v7166_v20  ;;  %v5196_v19 = vadd.f32 %v5195_v47, %v7130_v33  ;;  %v5164_v55 = vpop.f32.mrb[115].mxu0 }
 0x336   : > { %v3795_v46 = vadd.f32 %v7171_v38, %v3772_v42  ;;  %v3776_v42 = vmul.f32 %v7159_v54, %v7195_v16  ;;  %v3778_v16 = vmul.f32 %v7159_v54, %v7215_v8 }
 0x337   : > { %v4364_v53 = vpack.c.bf16 %v3826_v45, %v3825_v11  ;;  %v3482_v24 = vmul.f32 %v5196_v19, %v7166_v20  ;;  %v3504_v58 = vadd.f32 %v7180_v61, %v3481_v29 }
 0x338   : > { %v3157_v34 = vpop.f32.mrb[12].mxu1 }
 0x339   : > { %4411 = vst [vmem:[%s7210_s27 + $0x8] sm:$0xff] %v4364_v53   ;;  %v3809_v41 = vadd.f32 %v3791_v36, %v3504_v58  ;;  %v3505_v27 = vadd.f32 %v7180_v61, %v3482_v24  ;;  %v5197_v57 = vadd.f32 %v3157_v34, %v7096_v9  ;;  %v5043_v15 = vpop.f32.mrb[13].mxu1  ;;  %v3773_v58 = vmul.f32 %v7159_v54, %v7154_v56 }
 0x33a   : > { %v3160_v33 = vpop.f32.mrb[14].mxu1  ;;  %v7234_v48 = vpop.f32.mrb[116].mxu0  ;;  %v3774_v15 = vmul.f32 %v7159_v54, %v7173_v60 }
 0x33b   : > { %v3810_v0 = vadd.f32 %v3792_v37, %v3505_v27  ;;  %v5198_v3 = vadd.f32 %v5197_v57, %v7132_v52  ;;  %v5199_v40 = vadd.f32 %v3160_v33, %v7098_v35  ;;  %v5044_v12 = vpop.f32.mrb[15].mxu1  ;;  %v5167_v50 = vpop.f32.mrb[117].mxu0  ;;  %v3827_v9 = vmax.f32 %v3809_v41, 0.0 }
 0x33c   : > { %v7241_v26 = vpop.f32.mrb[118].mxu0  ;;  %v3797_v60 = vadd.f32 %v7171_v38, %v3774_v15 }
 0x33d   : > { %v3828_v5 = vmax.f32 %v3810_v0, 0.0  ;;  %v3483_v49 = vmul.f32 %v5198_v3, %v7166_v20  ;;  %v5200_v31 = vadd.f32 %v5199_v40, %v7134_v43  ;;  %v5168_v47 = vpop.f32.mrb[119].mxu0 }
 0x33f   : > { %v4369_v52 = vpack.c.bf16 %v3828_v5, %v3827_v9  ;;  %v3484_v35 = vmul.f32 %v5200_v31, %v7166_v20  ;;  %v3506_v23 = vadd.f32 %v7180_v61, %v3483_v49 }
 0x340   : > { %v3165_v59 = vpop.f32.mrb[16].mxu1 }
 0x341   : > { %4412 = vst [vmem:[%s7210_s27 + $0x10] sm:$0xff] %v4369_v52   ;;  %v3811_v36 = vadd.f32 %v3793_v63, %v3506_v23  ;;  %v3507_v11 = vadd.f32 %v7180_v61, %v3484_v35  ;;  %v5201_v45 = vadd.f32 %v3165_v59, %v7103_v17  ;;  %v5047_v29 = vpop.f32.mrb[17].mxu1  ;;  %v3775_v63 = vmul.f32 %v7159_v54, %v7182_v39 }
 0x342   : > { %v3168_v43 = vpop.f32.mrb[18].mxu1  ;;  %v3799_v29 = vadd.f32 %v7171_v38, %v3776_v42 }
 0x343   : > { %v3812_v19 = vadd.f32 %v3794_v7, %v3507_v11  ;;  %v5202_v55 = vadd.f32 %v5201_v45, %v7136_v1  ;;  %v5203_v53 = vadd.f32 %v3168_v43, %v7105_v30  ;;  %v5048_v24 = vpop.f32.mrb[19].mxu1  ;;  %v3829_v37 = vmax.f32 %v3811_v36, 0.0 }
 0x344   : > { %v3796_v1 = vadd.f32 %v7171_v38, %v3773_v58 }
 0x345   : > { %v3830_v34 = vmax.f32 %v3812_v19, 0.0  ;;  %v3485_v22 = vmul.f32 %v5202_v55, %v7166_v20  ;;  %v5204_v17 = vadd.f32 %v5203_v53, %v7138_v62  ;;  %v3777_v19 = vmul.f32 %v7159_v54, %v7201_v25 }
 0x347   : > { %v4374_v41 = vpack.c.bf16 %v3830_v34, %v3829_v37  ;;  %v3486_v27 = vmul.f32 %v5204_v17, %v7166_v20  ;;  %v3508_v57 = vadd.f32 %v7180_v61, %v3485_v22 }
 0x348   : > { %v3173_v30 = vpop.f32.mrb[20].mxu1 }
 0x349   : > { %4413 = vst [vmem:[%s7210_s27 + $0x18] sm:$0xff] %v4374_v41   ;;  %v3813_v56 = vadd.f32 %v3795_v46, %v3508_v57  ;;  %v3509_v33 = vadd.f32 %v7180_v61, %v3486_v27  ;;  %v5205_v0 = vadd.f32 %v3173_v30, %v7108_v10  ;;  %v5051_v3 = vpop.f32.mrb[21].mxu1  ;;  %v3800_v46 = vadd.f32 %v7171_v38, %v3777_v19 }
 0x34a   : > { %v3176_v62 = vpop.f32.mrb[22].mxu1  ;;  %v3779_v41 = vmul.f32 %v7159_v54, %v7222_v2 }
 0x34b   : > { %v3814_v40 = vadd.f32 %v3796_v1, %v3509_v33  ;;  %v5206_v12 = vadd.f32 %v5205_v0, %v7140_v13  ;;  %v5207_v6 = vadd.f32 %v3176_v62, %v7110_v51  ;;  %v5052_v50 = vpop.f32.mrb[23].mxu1  ;;  %v3831_v9 = vmax.f32 %v3813_v56, 0.0 }
 0x34c   : > { %v3798_v51 = vadd.f32 %v7171_v38, %v3775_v63  ;;  %v3802_v2 = vadd.f32 %v7171_v38, %v3779_v41  ;;  %v3781_v63 = vmul.f32 %v7159_v54, %v7241_v26 }
 0x34d   : > { %v3832_v5 = vmax.f32 %v3814_v40, 0.0  ;;  %v3487_v49 = vmul.f32 %v5206_v12, %v7166_v20  ;;  %v5208_v10 = vadd.f32 %v5207_v6, %v7142_v4 }
 0x34f   : > { %v4379_v31 = vpack.c.bf16 %v3832_v5, %v3831_v9  ;;  %v3488_v47 = vmul.f32 %v5208_v10, %v7166_v20  ;;  %v3510_v13 = vadd.f32 %v7180_v61, %v3487_v49 }
 0x351   : > { %4414 = vst [vmem:[%s7210_s27 + $0x20] sm:$0xff] %v4379_v31   ;;  %v3815_v52 = vadd.f32 %v3797_v60, %v3510_v13  ;;  %v3511_v39 = vadd.f32 %v7180_v61, %v3488_v47 }
 0x353   : > { %v3816_v35 = vadd.f32 %v3798_v51, %v3511_v39  ;;  %v3833_v23 = vmax.f32 %v3815_v52, 0.0 }
 0x355   : > { %v3834_v7 = vmax.f32 %v3816_v35, 0.0 }
 0x357   : > { %v4384_v59 = vpack.c.bf16 %v3834_v7, %v3833_v23 }
 0x359   : > { %4415 = vst [vmem:[%s7210_s27 + $0x28] sm:$0xff] %v4384_v59  }
 0x368   : > { %v3431_v4 = vpop.f32.mrb[24].mxu1 }
 0x369   : > { %v5209_v36 = vadd.f32 %v3431_v4, %v7112_v28  ;;  %v5107_v11 = vpop.f32.mrb[25].mxu1 }
 0x36a   : > { %v3434_v45 = vpop.f32.mrb[26].mxu1 }
 0x36b   : > { %v3489_v43 = vmul.f32 %v5209_v36, %v7166_v20  ;;  %v5210_v55 = vadd.f32 %v3434_v45, %v7114_v18  ;;  %v5108_v53 = vpop.f32.mrb[27].mxu1  ;;  %v3801_v18 = vadd.f32 %v7171_v38, %v3778_v16 }
 0x36d   : > { %v3512_v24 = vadd.f32 %v7180_v61, %v3489_v43  ;;  %v3490_v58 = vmul.f32 %v5210_v55, %v7166_v20 }
 0x36f   : > { %v3817_v28 = vadd.f32 %v3799_v29, %v3512_v24  ;;  %v3513_v37 = vadd.f32 %v7180_v61, %v3490_v58 }
 0x370   : > { %v3439_v34 = vpop.f32.mrb[28].mxu1 }
 0x371   : > { %v3818_v22 = vadd.f32 %v3800_v46, %v3513_v37  ;;  %v5211_v25 = vadd.f32 %v3439_v34, %v7116_v14  ;;  %v5111_v17 = vpop.f32.mrb[29].mxu1  ;;  %v3835_v57 = vmax.f32 %v3817_v28, 0.0  ;;  %v3780_v14 = vmul.f32 %v7159_v54, %v7234_v48 }
 0x372   : > { %v3442_v27 = vpop.f32.mrb[30].mxu1  ;;  %v3804_v54 = vadd.f32 %v7171_v38, %v3781_v63 }
 0x373   : > { %v3836_v1 = vmax.f32 %v3818_v22, 0.0  ;;  %v3491_v8 = vmul.f32 %v5211_v25, %v7166_v20  ;;  %v5212_v30 = vadd.f32 %v3442_v27, %v7118_v44  ;;  %v5112_v15 = vpop.f32.mrb[31].mxu1  ;;  %v3803_v50 = vadd.f32 %v7171_v38, %v3780_v14 }
 0x375   : > { %v4389_v56 = vpack.c.bf16 %v3836_v1, %v3835_v57  ;;  %v3514_v33 = vadd.f32 %v7180_v61, %v3491_v8  ;;  %v3492_v0 = vmul.f32 %v5212_v30, %v7166_v20 }
 0x377   : > { %4416 = vst [vmem:[%s7210_s27 + $0x30] sm:$0xff] %v4389_v56   ;;  %v3819_v3 = vadd.f32 %v3801_v18, %v3514_v33  ;;  %v3515_v62 = vadd.f32 %v7180_v61, %v3492_v0 }
 0x378   : > { %v3447_v40 = vpop.f32.mrb[32].mxu1 }
 0x379   : > { %v3820_v12 = vadd.f32 %v3802_v2, %v3515_v62  ;;  %v5213_v44 = vadd.f32 %v3447_v40, %v7120_v32  ;;  %v5115_v6 = vpop.f32.mrb[33].mxu1  ;;  %v3837_v60 = vmax.f32 %v3819_v3, 0.0 }
 0x37a   : > { %v3450_v48 = vpop.f32.mrb[34].mxu1 }
 0x37b   : > { %v3838_v9 = vmax.f32 %v3820_v12, 0.0  ;;  %v3493_v5 = vmul.f32 %v5213_v44, %v7166_v20  ;;  %v5214_v49 = vadd.f32 %v3450_v48, %v7122_v21  ;;  %v5116_v10 = vpop.f32.mrb[35].mxu1 }
 0x37d   : > { %v4394_v31 = vpack.c.bf16 %v3838_v9, %v3837_v60  ;;  %v3516_v32 = vadd.f32 %v7180_v61, %v3493_v5  ;;  %v3494_v47 = vmul.f32 %v5214_v49, %v7166_v20 }
 0x37f   : > { %4417 = vst [vmem:[%s7210_s27 + $0x38] sm:$0xff] %v4394_v31   ;;  %v3821_v13 = vadd.f32 %v3803_v50, %v3516_v32  ;;  %v3517_v26 = vadd.f32 %v7180_v61, %v3494_v47 }
 0x381   : > { %v3822_v51 = vadd.f32 %v3804_v54, %v3517_v26  ;;  %v3839_v21 = vmax.f32 %v3821_v13, 0.0 }
 0x383   : > { %v3840_v52 = vmax.f32 %v3822_v51, 0.0 }
 0x385   : > { %v4399_v39 = vpack.c.bf16 %v3840_v52, %v3839_v21 }
 0x387   : > { %4418 = vst [vmem:[%s7210_s27 + $0x40] sm:$0xff] %v4399_v39  }
 0x388   : > { %5700 = shalt.err (!%p5697_p7)
}
 0x389   : > { %s5701_s30 = scalar_lea.hbm %s7327_s17, 1152  ;;  %s5705_s13 = scalar_lea.hbm %s7391_s7, 4608 }
 0x38a   : > { %p5702_p9 = scmp.ne.s32.totalorder %s7327_s17, %s5701_s30  ;;  %p5706_p12 = scmp.lt.u32.totalorder %s7327_s17, %s7391_s7 }
 0x38b   : > { %p5707_p13 = scmp.lt.u32.totalorder %s5705_s13, %s5701_s30  ;;  %p5709_p1 = scmp.lt.u32.totalorder %s5701_s30, %s7327_s17 }
 0x38c   : > { %p5703_p10 = pnand %p5702_p9, %p5880_p3 }
 0x38d   : > { %p5708_p0 = por %p5707_p13, %p5706_p12 }
 0x38e   : > { %p5704_p11 = pneg %p5703_p10 }
 0x38f   : > { %p5710_p2 = por %p5709_p1, %p5708_p0 }
 0x391   : > { %p5711_p4 = pnand %p5710_p2, %p5704_p11 }
 0x393   : > { %5714 = shalt.err (!%p5711_p4)
}
 0x394   : > { %s5787_s28 = smov 64   ;;  %s5788_s16 = smov 4  }
 0x395   : > { %5447 = dma.vmem_to_hbm [thread:$0]  (%p5880_p3), %s7322_s18, 1152, %s7327_s17, %s7332_s11, %s5787_s28, %s5787_s28, %s5788_s16  }
 0x396 PF: > { %p5453_p5 = scmp.ge.s32.totalorder %s5781_s8, 2  ;;  %s3962_s20 = sand.u32 1, %s5753_s24  }
 0x397   : > { %s3963_s21 = scalar_lea.sflag [#allocation4], %s3962_s20 }
 0x398   : > { %p5450_p6 = pnand %p5453_p5, %p5889_p8 }
 0x39a   : > { %5748 = dma.done.wait (!%p5450_p6), %s3963_s21, 1152  }
 0x39b   : > { %5750 = vsyncadd (!%p5450_p6), %s3963_s21, 4294966144  ;;  %s20_s8 = sadd.s32 1, %s5781_s8   ;;  %s7404_s28 = sld [smem:[#allocation6_spill]] }
 0x39c   : > { %p17_p7 = scmp.ge.s32.totalorder %s20_s8, 6   ;;  %s7405_s14 = sld [smem:[#allocation7_spill]] }
 0x39d   : > { %s7406_s30 = sld [smem:[#allocation8_spill]]  ;;  %s7407_s24 = smov %s5757_s25 }
 0x39e   : > { %s7408_s25 = smov %s5761_s26  ;;  %s7409_s26 = smov %s5898_s19 }
 0x39f   : > { %s7410_s27 = smov %s5773_s29  ;;  %19 = sbr.rel (!%p17_p7) target bundleno = 5 (0x5), region = 88 }
 0x3a2   : > { %s7411_s29 = smov %s7405_s14 }
 0x3a6   :  { %3968 = vsyncpa [#allocation4], 1 }
 0x3a7   :  { %3970 = vsyncpa [#allocation4 + $0x1], 1 }

</bundles_post_ra>
